<compile_context>
chip_gen: v5e
topology: v5e:2x2
jax: 0.10.0
libtpu: 0.0.40
codegen_flags: <defaults>
</compile_context>

<pallas_src>
import functools

import jax
import jax.numpy as jnp
from jax.experimental import pallas as pl
from jax.experimental.pallas import tpu as pltpu


# Above the 16/32 MiB scoped defaults (v5e/v6e), within v7x's 64 MiB physical.
_VMEM_LIMIT_BYTES = 64 * 1024 * 1024
_CPARAMS = pltpu.CompilerParams(
    dimension_semantics=("parallel",),
    vmem_limit_bytes=_VMEM_LIMIT_BYTES,
)


# ----------------------------- Pallas kernels -----------------------------

def _ln_qkv_kernel(x_ref, g_ref, b_ref, w_ref, bias_ref, o_ref, *, eps):
    """Fused LayerNorm -> composed (to_qkv ∘ in_proj) projection.

    Output layout is (3, tm, D) (q/k/v planes) so the attention kernel can DMA
    per-batch lane-dense (L, D) tiles directly via BlockSpecs — no XLA
    transpose / head-split copy between kernels.
    """
    x = x_ref[...].astype(jnp.float32)
    mean = jnp.mean(x, axis=-1, keepdims=True)
    var = jnp.mean(jnp.square(x - mean), axis=-1, keepdims=True)
    h = (x - mean) * jax.lax.rsqrt(var + eps) * g_ref[...] + b_ref[...]
    # bf16 operands -> fast MXU path; f32 accumulation.
    y = jnp.dot(h.astype(jnp.bfloat16), w_ref[...],
                preferred_element_type=jnp.float32) + bias_ref[...]
    d = o_ref.shape[-1]
    o_ref[0] = y[:, :d].astype(o_ref.dtype)
    o_ref[1] = y[:, d:2 * d].astype(o_ref.dtype)
    o_ref[2] = y[:, 2 * d:].astype(o_ref.dtype)


def _attn_kernel(*refs, n_heads, has_attn_mask, has_pad_mask):
    """Multi-head attention for one batch element.

    Q/K/V arrive as lane-dense (L, D) tiles; heads are looped inside the
    kernel (amortizing the per-grid-step overhead over H heads) and the head
    outputs are re-concatenated along lanes before a single lane-dense (L, D)
    store. The (B*H, L, S) bias tensor is never materialized: a shared (L, S)
    additive mask and a per-batch (1, S) padding bias are combined in-register.
    The 1/sqrt(head_dim) scale is already folded into the Q projection weights.
    """
    q_ref, k_ref, v_ref = refs[0], refs[1], refs[2]
    idx = 3
    m_ref = None
    p_ref = None
    if has_attn_mask:
        m_ref = refs[idx]; idx += 1
    if has_pad_mask:
        p_ref = refs[idx]; idx += 1
    o_ref = refs[idx]

    q = q_ref[...].astype(jnp.bfloat16)
    k = k_ref[...].astype(jnp.bfloat16)
    v = v_ref[...].astype(jnp.bfloat16)

    bias = None
    if m_ref is not None:
        bias = m_ref[...]                       # (L, S) f32, shared
    if p_ref is not None:
        pb = p_ref[...]                         # (1, S) f32, broadcasts over L
        bias = pb if bias is None else bias + pb

    d = q.shape[-1]
    hd = d // n_heads
    dn = (((1,), (1,)), ((), ()))               # contract last dims; no .T materialized
    outs = []
    for h in range(n_heads):
        sl = slice(h * hd, (h + 1) * hd)
        s = jax.lax.dot_general(q[:, sl], k[:, sl], dn,
                                preferred_element_type=jnp.float32)   # (L, S)
        if bias is not None:
            s = s + bias
        s = s - jnp.max(s, axis=-1, keepdims=True)
        p = jnp.exp(s)
        l = jnp.sum(p, axis=-1, keepdims=True)
        o_h = jnp.dot(p.astype(jnp.bfloat16), v[:, sl],
                      preferred_element_type=jnp.float32)              # (L, hd)
        outs.append(o_h * pl.reciprocal(l, approx=True))
    # NOTE: for production sequence lengths, convert to flash-style (KV grid
    # axis "arbitrary" + online-softmax scratch) so the (L, S) tile never
    # exceeds VMEM (matters first on v7x's 64 MiB).
    o_ref[...] = jnp.concatenate(outs, axis=-1).astype(o_ref.dtype)


def _linear_residual_kernel(x_ref, w_ref, b_ref, res_ref, o_ref):
    # Fused composed (out_proj ∘ to_out) linear + residual-add epilogue.
    y = jnp.dot(x_ref[...].astype(jnp.bfloat16), w_ref[...],
                preferred_element_type=jnp.float32) + b_ref[...]
    o_ref[...] = (y + res_ref[...].astype(jnp.float32)).astype(o_ref.dtype)


def _ln_ffn_residual_kernel(x_ref, g_ref, b_ref, w1_ref, b1_ref, w2_ref, b2_ref,
                            o_ref, *, eps):
    # Fused LayerNorm -> Linear -> ReLU -> Linear -> residual-add.
    x = x_ref[...].astype(jnp.float32)
    mean = jnp.mean(x, axis=-1, keepdims=True)
    var = jnp.mean(jnp.square(x - mean), axis=-1, keepdims=True)
    h = (x - mean) * jax.lax.rsqrt(var + eps) * g_ref[...] + b_ref[...]
    h1 = jnp.dot(h.astype(jnp.bfloat16), w1_ref[...],
                 preferred_element_type=jnp.float32) + b1_ref[...]
    h1 = jnp.maximum(h1, 0.0)
    y = jnp.dot(h1.astype(jnp.bfloat16), w2_ref[...],
                preferred_element_type=jnp.float32) + b2_ref[...]
    o_ref[...] = (y + x).astype(o_ref.dtype)


# ------------------------------ thin wrappers ------------------------------

def _tile_m(m, cap=256):
    """Largest row tile <= cap that divides m AND leaves >= 2 grid steps
    (keeps the second v7x TensorCore busy and bounds f32 intermediates);
    falls back to the full extent for tiny / non-divisible m."""
    for t in (256, 128, 64, 32, 16, 8):
        if t <= cap and m % t == 0 and m // t >= 2:
            return t
    return m


def ln_linear_qkv(x2d, gamma, beta, w, b, eps=1e-5):
    # x2d (M, D); gamma/beta (1, D) f32; w (D, 3D) bf16; b (1, 3D) f32.
    # Output (3, M, D): q/k/v planes.
    M, D = x2d.shape
    N = w.shape[1]
    tm = _tile_m(M)
    return pl.pallas_call(
        functools.partial(_ln_qkv_kernel, eps=eps),
        out_shape=jax.ShapeDtypeStruct((3, M, D), x2d.dtype),
        grid=(M // tm,),
        in_specs=[pl.BlockSpec((tm, D), lambda i: (i, 0)),
                  pl.BlockSpec((1, D), lambda i: (0, 0)),
                  pl.BlockSpec((1, D), lambda i: (0, 0)),
                  pl.BlockSpec((D, N), lambda i: (0, 0)),
                  pl.BlockSpec((1, N), lambda i: (0, 0))],
        out_specs=pl.BlockSpec((3, tm, D), lambda i: (0, i, 0)),
        compiler_params=_CPARAMS,
    )(x2d, gamma, beta, w, b)


def attention(qkv3, attn_bias, pad_bias, n_heads):
    # qkv3 (3, B, L, D); attn_bias (L, S) f32 or None; pad_bias (B, 1, S) f32 or None.
    _, B, L, D = qkv3.shape
    S = L
    has_m = attn_bias is not None
    has_p = pad_bias is not None

    in_specs = [pl.BlockSpec((None, None, L, D), lambda b: (0, b, 0, 0)),
                pl.BlockSpec((None, None, L, D), lambda b: (1, b, 0, 0)),
                pl.BlockSpec((None, None, L, D), lambda b: (2, b, 0, 0))]
    args = [qkv3, qkv3, qkv3]
    if has_m:
        in_specs.append(pl.BlockSpec((L, S), lambda b: (0, 0)))
        args.append(attn_bias)
    if has_p:
        in_specs.append(pl.BlockSpec((None, 1, S), lambda b: (b, 0, 0)))
        args.append(pad_bias)

    kernel = functools.partial(_attn_kernel, n_heads=n_heads,
                               has_attn_mask=has_m, has_pad_mask=has_p)
    return pl.pallas_call(
        kernel,
        out_shape=jax.ShapeDtypeStruct((B, L, D), qkv3.dtype),
        grid=(B,),
        in_specs=in_specs,
        out_specs=pl.BlockSpec((None, L, D), lambda b: (b, 0, 0)),
        compiler_params=_CPARAMS,
    )(*args)


def linear_residual(x2d, w, b, res2d):
    # x2d (M, K); w (K, N) bf16; b (1, N) f32; res2d (M, N).
    M, K = x2d.shape
    N = w.shape[1]
    tm = _tile_m(M)
    return pl.pallas_call(
        _linear_residual_kernel,
        out_shape=jax.ShapeDtypeStruct((M, N), x2d.dtype),
        grid=(M // tm,),
        in_specs=[pl.BlockSpec((tm, K), lambda i: (i, 0)),
                  pl.BlockSpec((K, N), lambda i: (0, 0)),
                  pl.BlockSpec((1, N), lambda i: (0, 0)),
                  pl.BlockSpec((tm, N), lambda i: (i, 0))],
        out_specs=pl.BlockSpec((tm, N), lambda i: (i, 0)),
        compiler_params=_CPARAMS,
    )(x2d, w, b, res2d)


def ln_ffn_residual(x2d, gamma, beta, w1, b1, w2, b2, eps=1e-5):
    # x2d (M, D); w1 (D, d_ff) bf16; w2 (d_ff, D) bf16; biases (1, *) f32.
    M, D = x2d.shape
    d_ff = w1.shape[1]
    tm = _tile_m(M)   # cap keeps the (tm, d_ff) f32 intermediate small
    return pl.pallas_call(
        functools.partial(_ln_ffn_residual_kernel, eps=eps),
        out_shape=jax.ShapeDtypeStruct((M, D), x2d.dtype),
        grid=(M // tm,),
        in_specs=[pl.BlockSpec((tm, D), lambda i: (i, 0)),
                  pl.BlockSpec((1, D), lambda i: (0, 0)),
                  pl.BlockSpec((1, D), lambda i: (0, 0)),
                  pl.BlockSpec((D, d_ff), lambda i: (0, 0)),
                  pl.BlockSpec((1, d_ff), lambda i: (0, 0)),
                  pl.BlockSpec((d_ff, D), lambda i: (0, 0)),
                  pl.BlockSpec((1, D), lambda i: (0, 0))],
        out_specs=pl.BlockSpec((tm, D), lambda i: (i, 0)),
        compiler_params=_CPARAMS,
    )(x2d, gamma, beta, w1, b1, w2, b2)


# --------------------------- module-level glue ---------------------------

def _attn_sublayer(x2d, ln_g, ln_b, p, n_heads, L, B, attn_mask, pad_mask):
    """x2d (B*L, D) batch-major -> x2d + MHA(LN(x2d)) with composed weights."""
    M, D = x2d.shape

    # Fused LN + composed QKV projection; output already in (3, M, D) planes.
    qkv = ln_linear_qkv(x2d, ln_g, ln_b, p["w_qkv"], p["b_qkv"])
    qkv3 = qkv.reshape(3, B, L, D)                       # free reshape

    attn_bias = None
    if attn_mask is not None:
        am = jnp.asarray(attn_mask)
        if am.ndim == 3 and am.shape[0] == 1:
            am = am[0]
        if am.ndim != 2:
            raise NotImplementedError("only shared 2-D attn_mask supported")
        if am.dtype == jnp.bool_:
            am = jnp.where(am, -1e30, 0.0)
        attn_bias = am.astype(jnp.float32)

    pad_bias = None
    if pad_mask is not None:
        # -1e30 (finite) instead of -inf: fully-padded rows stay NaN-free.
        pad_bias = jnp.where(pad_mask, -1e30, 0.0).astype(jnp.float32).reshape(B, 1, L)

    o = attention(qkv3, attn_bias, pad_bias, n_heads)    # (B, L, D)

    # Fused composed (out_proj ∘ to_out) linear + residual add (dropout = identity).
    return linear_residual(o.reshape(M, D), p["w_out"], p["b_out"], x2d)


def decoder_layer(x, enc_out, params, *, n_heads, attn_mask=None, pad_mask=None):
    L, B, D = x.shape
    # One layout change to batch-major; every kernel boundary below is a free reshape.
    x2 = jnp.transpose(x, (1, 0, 2)).reshape(B * L, D)
    x2 = _attn_sublayer(x2, params["ln1_g"], params["ln1_b"], params["attn1"],
                        n_heads, L, B, attn_mask, pad_mask)
    # Faithful to reference: enc_out fills the attn_mask argument of attn2.
    x2 = _attn_sublayer(x2, params["ln2_g"], params["ln2_b"], params["attn2"],
                        n_heads, L, B, enc_out, pad_mask)
    x2 = ln_ffn_residual(x2, params["ln3_g"], params["ln3_b"],
                         params["ff_w1"], params["ff_b1"],
                         params["ff_w2"], params["ff_b2"])
    return jnp.transpose(x2.reshape(B, L, D), (1, 0, 2))


# ------------------------------ parameters ------------------------------

def init_params(key, d_model, n_heads, d_ff):
    """Raw parameters in PyTorch layouts ((out, in) weights)."""
    def dense(k, shape):
        return 0.02 * jax.random.normal(k, shape, jnp.float32)

    def mha(k):
        ks = jax.random.split(k, 4)
        return {
            "to_qkv_w": dense(ks[0], (3 * d_model, d_model)),
            "to_qkv_b": jnp.zeros((3 * d_model,), jnp.float32),
            "in_proj_w": dense(ks[1], (3 * d_model, d_model)),
            "in_proj_b": jnp.zeros((3 * d_model,), jnp.float32),
            "out_proj_w": dense(ks[2], (d_model, d_model)),
            "out_proj_b": jnp.zeros((d_model,), jnp.float32),
            "to_out_w": dense(ks[3], (d_model, d_model)),
            "to_out_b": jnp.zeros((d_model,), jnp.float32),
        }

    keys = jax.random.split(key, 4)
    return {
        "attn1": mha(keys[0]),
        "attn2": mha(keys[1]),
        "ff_w1": dense(keys[2], (d_ff, d_model)),
        "ff_b1": jnp.zeros((d_ff,), jnp.float32),
        "ff_w2": dense(keys[3], (d_model, d_ff)),
        "ff_b2": jnp.zeros((d_model,), jnp.float32),
        "ln1_g": jnp.ones((d_model,), jnp.float32),
        "ln1_b": jnp.zeros((d_model,), jnp.float32),
        "ln2_g": jnp.ones((d_model,), jnp.float32),
        "ln2_b": jnp.zeros((d_model,), jnp.float32),
        "ln3_g": jnp.ones((d_model,), jnp.float32),
        "ln3_b": jnp.zeros((d_model,), jnp.float32),
    }


def prepare_params(raw, n_heads):
    """Fold per-MHA linear chains into composed weights, fold the 1/sqrt(hd)
    attention scale into the Q projection, pre-transpose everything to (K, N),
    and cast matmul weights to bf16 (biases / LN params stay f32)."""
    def fold_mha(m):
        D = m["out_proj_w"].shape[0]
        scale = 1.0 / ((D // n_heads) ** 0.5)
        comp_w, comp_b = [], []
        for idx in range(3):
            w_a = m["to_qkv_w"][idx * D:(idx + 1) * D]   # x -> q/k/v   (D, D)
            b_a = m["to_qkv_b"][idx * D:(idx + 1) * D]
            w_b = m["in_proj_w"][idx * D:(idx + 1) * D]  # q -> q_proj  (D, D)
            b_b = m["in_proj_b"][idx * D:(idx + 1) * D]
            w_c = w_b @ w_a                              # (D, D), torch layout
            b_c = w_b @ b_a + b_b
            if idx == 0:                                 # fold softmax scale into Q
                w_c = w_c * scale
                b_c = b_c * scale
            comp_w.append(w_c)
            comp_b.append(b_c)
        w_qkv = jnp.concatenate(comp_w, axis=0)          # (3D, D)
        b_qkv = jnp.concatenate(comp_b, axis=0)          # (3D,)
        w_out = m["to_out_w"] @ m["out_proj_w"]          # (D, D)
        b_out = m["to_out_w"] @ m["out_proj_b"] + m["to_out_b"]
        return {
            "w_qkv": jnp.transpose(w_qkv).astype(jnp.bfloat16),   # (D, 3D)
            "b_qkv": b_qkv.reshape(1, -1),
            "w_out": jnp.transpose(w_out).astype(jnp.bfloat16),   # (D, D)
            "b_out": b_out.reshape(1, -1),
        }

    d_model = raw["ln1_g"].shape[0]
    return {
        "attn1": fold_mha(raw["attn1"]),
        "attn2": fold_mha(raw["attn2"]),
        "ff_w1": jnp.transpose(raw["ff_w1"]).astype(jnp.bfloat16),  # (D, d_ff)
        "ff_b1": raw["ff_b1"].reshape(1, -1),
        "ff_w2": jnp.transpose(raw["ff_w2"]).astype(jnp.bfloat16),  # (d_ff, D)
        "ff_b2": raw["ff_b2"].reshape(1, -1),
        "ln1_g": raw["ln1_g"].reshape(1, d_model),
        "ln1_b": raw["ln1_b"].reshape(1, d_model),
        "ln2_g": raw["ln2_g"].reshape(1, d_model),
        "ln2_b": raw["ln2_b"].reshape(1, d_model),
        "ln3_g": raw["ln3_g"].reshape(1, d_model),
        "ln3_b": raw["ln3_b"].reshape(1, d_model),
    }


# --------------------------------- main ---------------------------------

if __name__ == "__main__":
    d_model, n_heads, d_ff = 32, 4, 64
    L, B = 8, 2

    key = jax.random.PRNGKey(0)
    kx, ke, kp = jax.random.split(key, 3)
    x = jax.random.normal(kx, (L, B, d_model), jnp.float32)
    # enc_out is consumed as a float additive attention mask by attn2 (exactly
    # as in the reference forward), so give it the (L, L) mask shape.
    enc_out = 0.1 * jax.random.normal(ke, (L, L), jnp.float32)

    raw_params = init_params(kp, d_model, n_heads, d_ff)
    params = prepare_params(raw_params, n_heads)   # composed, scaled, bf16, done once

    fwd = jax.jit(functools.partial(decoder_layer, n_heads=n_heads))
    out = fwd(x, enc_out, params)
    jax.block_until_ready(out)
    assert out.shape == (L, B, d_model) and out.dtype == jnp.float32
    assert bool(jnp.all(jnp.isfinite(out)))
    print("KERNEL_OK")
</pallas_src>

<mosaic_0001>
module attributes {stable_mosaic.version = 11 : i64} {
  func.func @_linear_residual_kernel(%arg0: i32, %arg1: memref<8x32xf32, #tpu.memory_space<vmem>>, %arg2: memref<32x32xbf16, #tpu.memory_space<vmem>>, %arg3: memref<1x32xf32, #tpu.memory_space<vmem>>, %arg4: memref<8x32xf32, #tpu.memory_space<vmem>>, %arg5: memref<8x32xf32, #tpu.memory_space<vmem>>) attributes {dimension_semantics = [#tpu.dimension_semantics<parallel>], iteration_bounds = array<i64: 2>, scalar_prefetch = 0 : i64, scratch_operands = 0 : i64, tpu.core_type = #tpu.core_type<tc>, window_params = [{transform_indices = @transform_0, window_bounds = array<i64: 8, 32>}, {pipeline_mode = #tpu.pipeline_mode<synchronous>, transform_indices = @transform_1, window_bounds = array<i64: 32, 32>}, {pipeline_mode = #tpu.pipeline_mode<synchronous>, transform_indices = @transform_2, window_bounds = array<i64: 1, 32>}, {transform_indices = @transform_3, window_bounds = array<i64: 8, 32>}, {transform_indices = @transform_4, window_bounds = array<i64: 8, 32>}]} {
    %c0 = arith.constant 0 : index
    %c0_0 = arith.constant 0 : index
    %0 = vector.load %arg1[%c0, %c0_0] : memref<8x32xf32, #tpu.memory_space<vmem>>, vector<8x32xf32>
    %1 = arith.truncf %0 : vector<8x32xf32> to vector<8x32xbf16>
    %c0_1 = arith.constant 0 : index
    %c0_2 = arith.constant 0 : index
    %2 = vector.load %arg2[%c0_1, %c0_2] : memref<32x32xbf16, #tpu.memory_space<vmem>>, vector<32x32xbf16>
    %cst = arith.constant dense<0.000000e+00> : vector<8x32xf32>
    %3 = tpu.matmul %1, %2, %cst {dimension_numbers = #tpu.dot_dimension_numbers<[1], [0], [0], [1], [0, 0, 1, 1], [], []>} : vector<8x32xbf16>, vector<32x32xbf16>, vector<8x32xf32> -> vector<8x32xf32>
    %c0_3 = arith.constant 0 : index
    %c0_4 = arith.constant 0 : index
    %4 = vector.load %arg3[%c0_3, %c0_4] : memref<1x32xf32, #tpu.memory_space<vmem>>, vector<1x32xf32>
    %5 = vector.broadcast %4 : vector<1x32xf32> to vector<8x32xf32>
    %6 = arith.addf %3, %5 : vector<8x32xf32>
    %c0_5 = arith.constant 0 : index
    %c0_6 = arith.constant 0 : index
    %7 = vector.load %arg4[%c0_5, %c0_6] : memref<8x32xf32, #tpu.memory_space<vmem>>, vector<8x32xf32>
    %8 = arith.addf %6, %7 : vector<8x32xf32>
    %c0_7 = arith.constant 0 : index
    %c0_8 = arith.constant 0 : index
    %9 = vector.load %arg5[%c0_7, %c0_8] : memref<8x32xf32, #tpu.memory_space<vmem>>, vector<8x32xf32>
    tpu.vector_store %arg5[%c0_7, %c0_8], %8 {strides = array<i32>} : memref<8x32xf32, #tpu.memory_space<vmem>>, vector<8x32xf32>,
    return
  }
  func.func @transform_0(%arg0: i32) -> (i32, i32) {
    %c0_i32 = arith.constant 0 : i32
    %c0_i32_0 = arith.constant 0 : i32
    return %arg0, %c0_i32 : i32, i32
  }
  func.func @transform_1(%arg0: i32) -> (i32, i32) {
    %c0_i32 = arith.constant 0 : i32
    %c0_i32_0 = arith.constant 0 : i32
    %c0_i32_1 = arith.constant 0 : i32
    return %c0_i32, %c0_i32_0 : i32, i32
  }
  func.func @transform_2(%arg0: i32) -> (i32, i32) {
    %c0_i32 = arith.constant 0 : i32
    %c0_i32_0 = arith.constant 0 : i32
    %c0_i32_1 = arith.constant 0 : i32
    return %c0_i32, %c0_i32_0 : i32, i32
  }
  func.func @transform_3(%arg0: i32) -> (i32, i32) {
    %c0_i32 = arith.constant 0 : i32
    %c0_i32_0 = arith.constant 0 : i32
    return %arg0, %c0_i32 : i32, i32
  }
  func.func @transform_4(%arg0: i32) -> (i32, i32) {
    %c0_i32 = arith.constant 0 : i32
    %c0_i32_0 = arith.constant 0 : i32
    return %arg0, %c0_i32 : i32, i32
  }
}

module attributes {stable_mosaic.version = 11 : i64} {
  func.func @_attn_kernel(%arg0: i32, %arg1: memref<1x1x8x32xf32, #tpu.memory_space<vmem>>, %arg2: memref<1x1x8x32xf32, #tpu.memory_space<vmem>>, %arg3: memref<1x1x8x32xf32, #tpu.memory_space<vmem>>, %arg4: memref<1x8x32xf32, #tpu.memory_space<vmem>>) attributes {dimension_semantics = [#tpu.dimension_semantics<parallel>], iteration_bounds = array<i64: 2>, scalar_prefetch = 0 : i64, scratch_operands = 0 : i64, tpu.core_type = #tpu.core_type<tc>, window_params = [{transform_indices = @transform_0, window_bounds = array<i64: 1, 1, 8, 32>}, {transform_indices = @transform_1, window_bounds = array<i64: 1, 1, 8, 32>}, {transform_indices = @transform_2, window_bounds = array<i64: 1, 1, 8, 32>}, {transform_indices = @transform_3, window_bounds = array<i64: 1, 8, 32>}]} {
    %c0 = arith.constant 0 : index
    %c0_0 = arith.constant 0 : index
    %c0_1 = arith.constant 0 : index
    %c0_2 = arith.constant 0 : index
    %0 = vector.load %arg1[%c0, %c0_0, %c0_1, %c0_2] : memref<1x1x8x32xf32, #tpu.memory_space<vmem>>, vector<1x1x8x32xf32>
    %1 = vector.shape_cast %0 : vector<1x1x8x32xf32> to vector<8x32xf32>
    %2 = arith.truncf %1 : vector<8x32xf32> to vector<8x32xbf16>
    %c0_3 = arith.constant 0 : index
    %c0_4 = arith.constant 0 : index
    %c0_5 = arith.constant 0 : index
    %c0_6 = arith.constant 0 : index
    %3 = vector.load %arg2[%c0_3, %c0_4, %c0_5, %c0_6] : memref<1x1x8x32xf32, #tpu.memory_space<vmem>>, vector<1x1x8x32xf32>
    %4 = vector.shape_cast %3 : vector<1x1x8x32xf32> to vector<8x32xf32>
    %5 = arith.truncf %4 : vector<8x32xf32> to vector<8x32xbf16>
    %c0_7 = arith.constant 0 : index
    %c0_8 = arith.constant 0 : index
    %c0_9 = arith.constant 0 : index
    %c0_10 = arith.constant 0 : index
    %6 = vector.load %arg3[%c0_7, %c0_8, %c0_9, %c0_10] : memref<1x1x8x32xf32, #tpu.memory_space<vmem>>, vector<1x1x8x32xf32>
    %7 = vector.shape_cast %6 : vector<1x1x8x32xf32> to vector<8x32xf32>
    %8 = arith.truncf %7 : vector<8x32xf32> to vector<8x32xbf16>
    %9 = vector.extract_strided_slice %2 {offsets = [0, 0], sizes = [8, 8], strides = [1, 1]} : vector<8x32xbf16> to vector<8x8xbf16>
    %10 = vector.extract_strided_slice %5 {offsets = [0, 0], sizes = [8, 8], strides = [1, 1]} : vector<8x32xbf16> to vector<8x8xbf16>
    %cst = arith.constant dense<0.000000e+00> : vector<8x8xf32>
    %11 = tpu.matmul %9, %10, %cst {dimension_numbers = #tpu.dot_dimension_numbers<[1], [1], [0], [0], [0, 0, 1, 0], [], []>} : vector<8x8xbf16>, vector<8x8xbf16>, vector<8x8xf32> -> vector<8x8xf32>
    %cst_11 = arith.constant dense<0xFF800000> : vector<8xf32>
    %12 = vector.multi_reduction <maximumf>, %11, %cst_11 [1] : vector<8x8xf32> to vector<8xf32>
    %13 = vector.shape_cast %12 : vector<8xf32> to vector<8x1xf32>
    %14 = vector.broadcast %13 : vector<8x1xf32> to vector<8x8xf32>
    %15 = arith.subf %11, %14 : vector<8x8xf32>
    %16 = math.exp %15 : vector<8x8xf32>
    %cst_12 = arith.constant dense<0.000000e+00> : vector<8xf32>
    %17 = vector.multi_reduction <add>, %16, %cst_12 [1] : vector<8x8xf32> to vector<8xf32>
    %18 = vector.shape_cast %17 : vector<8xf32> to vector<8x1xf32>
    %19 = arith.truncf %16 : vector<8x8xf32> to vector<8x8xbf16>
    %20 = vector.extract_strided_slice %8 {offsets = [0, 0], sizes = [8, 8], strides = [1, 1]} : vector<8x32xbf16> to vector<8x8xbf16>
    %cst_13 = arith.constant dense<0.000000e+00> : vector<8x8xf32>
    %21 = tpu.matmul %19, %20, %cst_13 {dimension_numbers = #tpu.dot_dimension_numbers<[1], [0], [0], [1], [0, 0, 1, 1], [], []>} : vector<8x8xbf16>, vector<8x8xbf16>, vector<8x8xf32> -> vector<8x8xf32>
    %22 = tpu.reciprocal %18 {approx = true} : vector<8x1xf32> -> vector<8x1xf32>
    %23 = vector.broadcast %22 : vector<8x1xf32> to vector<8x8xf32>
    %24 = arith.mulf %21, %23 : vector<8x8xf32>
    %25 = vector.extract_strided_slice %2 {offsets = [0, 8], sizes = [8, 8], strides = [1, 1]} : vector<8x32xbf16> to vector<8x8xbf16>
    %26 = vector.extract_strided_slice %5 {offsets = [0, 8], sizes = [8, 8], strides = [1, 1]} : vector<8x32xbf16> to vector<8x8xbf16>
    %cst_14 = arith.constant dense<0.000000e+00> : vector<8x8xf32>
    %27 = tpu.matmul %25, %26, %cst_14 {dimension_numbers = #tpu.dot_dimension_numbers<[1], [1], [0], [0], [0, 0, 1, 0], [], []>} : vector<8x8xbf16>, vector<8x8xbf16>, vector<8x8xf32> -> vector<8x8xf32>
    %cst_15 = arith.constant dense<0xFF800000> : vector<8xf32>
    %28 = vector.multi_reduction <maximumf>, %27, %cst_15 [1] : vector<8x8xf32> to vector<8xf32>
    %29 = vector.shape_cast %28 : vector<8xf32> to vector<8x1xf32>
    %30 = vector.broadcast %29 : vector<8x1xf32> to vector<8x8xf32>
    %31 = arith.subf %27, %30 : vector<8x8xf32>
    %32 = math.exp %31 : vector<8x8xf32>
    %cst_16 = arith.constant dense<0.000000e+00> : vector<8xf32>
    %33 = vector.multi_reduction <add>, %32, %cst_16 [1] : vector<8x8xf32> to vector<8xf32>
    %34 = vector.shape_cast %33 : vector<8xf32> to vector<8x1xf32>
    %35 = arith.truncf %32 : vector<8x8xf32> to vector<8x8xbf16>
    %36 = vector.extract_strided_slice %8 {offsets = [0, 8], sizes = [8, 8], strides = [1, 1]} : vector<8x32xbf16> to vector<8x8xbf16>
    %cst_17 = arith.constant dense<0.000000e+00> : vector<8x8xf32>
    %37 = tpu.matmul %35, %36, %cst_17 {dimension_numbers = #tpu.dot_dimension_numbers<[1], [0], [0], [1], [0, 0, 1, 1], [], []>} : vector<8x8xbf16>, vector<8x8xbf16>, vector<8x8xf32> -> vector<8x8xf32>
    %38 = tpu.reciprocal %34 {approx = true} : vector<8x1xf32> -> vector<8x1xf32>
    %39 = vector.broadcast %38 : vector<8x1xf32> to vector<8x8xf32>
    %40 = arith.mulf %37, %39 : vector<8x8xf32>
    %41 = vector.extract_strided_slice %2 {offsets = [0, 16], sizes = [8, 8], strides = [1, 1]} : vector<8x32xbf16> to vector<8x8xbf16>
    %42 = vector.extract_strided_slice %5 {offsets = [0, 16], sizes = [8, 8], strides = [1, 1]} : vector<8x32xbf16> to vector<8x8xbf16>
    %cst_18 = arith.constant dense<0.000000e+00> : vector<8x8xf32>
    %43 = tpu.matmul %41, %42, %cst_18 {dimension_numbers = #tpu.dot_dimension_numbers<[1], [1], [0], [0], [0, 0, 1, 0], [], []>} : vector<8x8xbf16>, vector<8x8xbf16>, vector<8x8xf32> -> vector<8x8xf32>
    %cst_19 = arith.constant dense<0xFF800000> : vector<8xf32>
    %44 = vector.multi_reduction <maximumf>, %43, %cst_19 [1] : vector<8x8xf32> to vector<8xf32>
    %45 = vector.shape_cast %44 : vector<8xf32> to vector<8x1xf32>
    %46 = vector.broadcast %45 : vector<8x1xf32> to vector<8x8xf32>
    %47 = arith.subf %43, %46 : vector<8x8xf32>
    %48 = math.exp %47 : vector<8x8xf32>
    %cst_20 = arith.constant dense<0.000000e+00> : vector<8xf32>
    %49 = vector.multi_reduction <add>, %48, %cst_20 [1] : vector<8x8xf32> to vector<8xf32>
    %50 = vector.shape_cast %49 : vector<8xf32> to vector<8x1xf32>
    %51 = arith.truncf %48 : vector<8x8xf32> to vector<8x8xbf16>
    %52 = vector.extract_strided_slice %8 {offsets = [0, 16], sizes = [8, 8], strides = [1, 1]} : vector<8x32xbf16> to vector<8x8xbf16>
    %cst_21 = arith.constant dense<0.000000e+00> : vector<8x8xf32>
    %53 = tpu.matmul %51, %52, %cst_21 {dimension_numbers = #tpu.dot_dimension_numbers<[1], [0], [0], [1], [0, 0, 1, 1], [], []>} : vector<8x8xbf16>, vector<8x8xbf16>, vector<8x8xf32> -> vector<8x8xf32>
    %54 = tpu.reciprocal %50 {approx = true} : vector<8x1xf32> -> vector<8x1xf32>
    %55 = vector.broadcast %54 : vector<8x1xf32> to vector<8x8xf32>
    %56 = arith.mulf %53, %55 : vector<8x8xf32>
    %57 = vector.extract_strided_slice %2 {offsets = [0, 24], sizes = [8, 8], strides = [1, 1]} : vector<8x32xbf16> to vector<8x8xbf16>
    %58 = vector.extract_strided_slice %5 {offsets = [0, 24], sizes = [8, 8], strides = [1, 1]} : vector<8x32xbf16> to vector<8x8xbf16>
    %cst_22 = arith.constant dense<0.000000e+00> : vector<8x8xf32>
    %59 = tpu.matmul %57, %58, %cst_22 {dimension_numbers = #tpu.dot_dimension_numbers<[1], [1], [0], [0], [0, 0, 1, 0], [], []>} : vector<8x8xbf16>, vector<8x8xbf16>, vector<8x8xf32> -> vector<8x8xf32>
    %cst_23 = arith.constant dense<0xFF800000> : vector<8xf32>
    %60 = vector.multi_reduction <maximumf>, %59, %cst_23 [1] : vector<8x8xf32> to vector<8xf32>
    %61 = vector.shape_cast %60 : vector<8xf32> to vector<8x1xf32>
    %62 = vector.broadcast %61 : vector<8x1xf32> to vector<8x8xf32>
    %63 = arith.subf %59, %62 : vector<8x8xf32>
    %64 = math.exp %63 : vector<8x8xf32>
    %cst_24 = arith.constant dense<0.000000e+00> : vector<8xf32>
    %65 = vector.multi_reduction <add>, %64, %cst_24 [1] : vector<8x8xf32> to vector<8xf32>
    %66 = vector.shape_cast %65 : vector<8xf32> to vector<8x1xf32>
    %67 = arith.truncf %64 : vector<8x8xf32> to vector<8x8xbf16>
    %68 = vector.extract_strided_slice %8 {offsets = [0, 24], sizes = [8, 8], strides = [1, 1]} : vector<8x32xbf16> to vector<8x8xbf16>
    %cst_25 = arith.constant dense<0.000000e+00> : vector<8x8xf32>
    %69 = tpu.matmul %67, %68, %cst_25 {dimension_numbers = #tpu.dot_dimension_numbers<[1], [0], [0], [1], [0, 0, 1, 1], [], []>} : vector<8x8xbf16>, vector<8x8xbf16>, vector<8x8xf32> -> vector<8x8xf32>
    %70 = tpu.reciprocal %66 {approx = true} : vector<8x1xf32> -> vector<8x1xf32>
    %71 = vector.broadcast %70 : vector<8x1xf32> to vector<8x8xf32>
    %72 = arith.mulf %69, %71 : vector<8x8xf32>
    %73 = tpu.concatenate %24, %40, %56, %72 in 1 : vector<8x8xf32>, vector<8x8xf32>, vector<8x8xf32>, vector<8x8xf32> -> vector<8x32xf32>
    %c0_26 = arith.constant 0 : index
    %c0_27 = arith.constant 0 : index
    %c0_28 = arith.constant 0 : index
    %74 = vector.load %arg4[%c0_26, %c0_27, %c0_28] : memref<1x8x32xf32, #tpu.memory_space<vmem>>, vector<1x8x32xf32>
    %75 = vector.shape_cast %74 : vector<1x8x32xf32> to vector<8x32xf32>
    %76 = vector.shape_cast %73 : vector<8x32xf32> to vector<1x8x32xf32>
    tpu.vector_store %arg4[%c0_26, %c0_27, %c0_28], %76 {strides = array<i32>} : memref<1x8x32xf32, #tpu.memory_space<vmem>>, vector<1x8x32xf32>,
    return
  }
  func.func @transform_0(%arg0: i32) -> (i32, i32, i32, i32) {
    %c0_i32 = arith.constant 0 : i32
    %c0_i32_0 = arith.constant 0 : i32
    %c0_i32_1 = arith.constant 0 : i32
    %c0_i32_2 = arith.constant 0 : i32
    return %c0_i32, %arg0, %c0_i32_0, %c0_i32_1 : i32, i32, i32, i32
  }
  func.func @transform_1(%arg0: i32) -> (i32, i32, i32, i32) {
    %c1_i32 = arith.constant 1 : i32
    %c0_i32 = arith.constant 0 : i32
    %c0_i32_0 = arith.constant 0 : i32
    %c0_i32_1 = arith.constant 0 : i32
    return %c1_i32, %arg0, %c0_i32, %c0_i32_0 : i32, i32, i32, i32
  }
  func.func @transform_2(%arg0: i32) -> (i32, i32, i32, i32) {
    %c2_i32 = arith.constant 2 : i32
    %c0_i32 = arith.constant 0 : i32
    %c0_i32_0 = arith.constant 0 : i32
    %c0_i32_1 = arith.constant 0 : i32
    return %c2_i32, %arg0, %c0_i32, %c0_i32_0 : i32, i32, i32, i32
  }
  func.func @transform_3(%arg0: i32) -> (i32, i32, i32) {
    %c0_i32 = arith.constant 0 : i32
    %c0_i32_0 = arith.constant 0 : i32
    %c0_i32_1 = arith.constant 0 : i32
    return %arg0, %c0_i32, %c0_i32_0 : i32, i32, i32
  }
}

module attributes {stable_mosaic.version = 11 : i64} {
  func.func @_ln_qkv_kernel(%arg0: i32, %arg1: memref<8x32xf32, #tpu.memory_space<vmem>>, %arg2: memref<1x32xf32, #tpu.memory_space<vmem>>, %arg3: memref<1x32xf32, #tpu.memory_space<vmem>>, %arg4: memref<32x96xbf16, #tpu.memory_space<vmem>>, %arg5: memref<1x96xf32, #tpu.memory_space<vmem>>, %arg6: memref<3x8x32xf32, #tpu.memory_space<vmem>>) attributes {dimension_semantics = [#tpu.dimension_semantics<parallel>], iteration_bounds = array<i64: 2>, scalar_prefetch = 0 : i64, scratch_operands = 0 : i64, tpu.core_type = #tpu.core_type<tc>, window_params = [{transform_indices = @transform_0, window_bounds = array<i64: 8, 32>}, {pipeline_mode = #tpu.pipeline_mode<synchronous>, transform_indices = @transform_1, window_bounds = array<i64: 1, 32>}, {pipeline_mode = #tpu.pipeline_mode<synchronous>, transform_indices = @transform_2, window_bounds = array<i64: 1, 32>}, {pipeline_mode = #tpu.pipeline_mode<synchronous>, transform_indices = @transform_3, window_bounds = array<i64: 32, 96>}, {pipeline_mode = #tpu.pipeline_mode<synchronous>, transform_indices = @transform_4, window_bounds = array<i64: 1, 96>}, {transform_indices = @transform_5, window_bounds = array<i64: 3, 8, 32>}]} {
    %c0 = arith.constant 0 : index
    %c0_0 = arith.constant 0 : index
    %0 = vector.load %arg1[%c0, %c0_0] : memref<8x32xf32, #tpu.memory_space<vmem>>, vector<8x32xf32>
    %cst = arith.constant dense<0.000000e+00> : vector<8xf32>
    %1 = vector.multi_reduction <add>, %0, %cst [1] : vector<8x32xf32> to vector<8xf32>
    %2 = vector.shape_cast %1 : vector<8xf32> to vector<8x1xf32>
    %cst_1 = arith.constant 3.200000e+01 : f32
    %3 = vector.broadcast %cst_1 : f32 to vector<8x1xf32>
    %4 = arith.divf %2, %3 : vector<8x1xf32>
    %5 = vector.broadcast %4 : vector<8x1xf32> to vector<8x32xf32>
    %6 = arith.subf %0, %5 : vector<8x32xf32>
    %7 = arith.mulf %6, %6 : vector<8x32xf32>
    %cst_2 = arith.constant dense<0.000000e+00> : vector<8xf32>
    %8 = vector.multi_reduction <add>, %7, %cst_2 [1] : vector<8x32xf32> to vector<8xf32>
    %9 = vector.shape_cast %8 : vector<8xf32> to vector<8x1xf32>
    %cst_3 = arith.constant 3.200000e+01 : f32
    %10 = vector.broadcast %cst_3 : f32 to vector<8x1xf32>
    %11 = arith.divf %9, %10 : vector<8x1xf32>
    %12 = vector.broadcast %4 : vector<8x1xf32> to vector<8x32xf32>
    %13 = arith.subf %0, %12 : vector<8x32xf32>
    %cst_4 = arith.constant 9.99999974E-6 : f32
    %14 = vector.broadcast %cst_4 : f32 to vector<8x1xf32>
    %15 = arith.addf %11, %14 : vector<8x1xf32>
    %16 = math.rsqrt %15 : vector<8x1xf32>
    %17 = vector.broadcast %16 : vector<8x1xf32> to vector<8x32xf32>
    %18 = arith.mulf %13, %17 : vector<8x32xf32>
    %c0_5 = arith.constant 0 : index
    %c0_6 = arith.constant 0 : index
    %19 = vector.load %arg2[%c0_5, %c0_6] : memref<1x32xf32, #tpu.memory_space<vmem>>, vector<1x32xf32>
    %20 = vector.broadcast %19 : vector<1x32xf32> to vector<8x32xf32>
    %21 = arith.mulf %18, %20 : vector<8x32xf32>
    %c0_7 = arith.constant 0 : index
    %c0_8 = arith.constant 0 : index
    %22 = vector.load %arg3[%c0_7, %c0_8] : memref<1x32xf32, #tpu.memory_space<vmem>>, vector<1x32xf32>
    %23 = vector.broadcast %22 : vector<1x32xf32> to vector<8x32xf32>
    %24 = arith.addf %21, %23 : vector<8x32xf32>
    %25 = arith.truncf %24 : vector<8x32xf32> to vector<8x32xbf16>
    %c0_9 = arith.constant 0 : index
    %c0_10 = arith.constant 0 : index
    %26 = vector.load %arg4[%c0_9, %c0_10] : memref<32x96xbf16, #tpu.memory_space<vmem>>, vector<32x96xbf16>
    %cst_11 = arith.constant dense<0.000000e+00> : vector<8x96xf32>
    %27 = tpu.matmul %25, %26, %cst_11 {dimension_numbers = #tpu.dot_dimension_numbers<[1], [0], [0], [1], [0, 0, 1, 1], [], []>} : vector<8x32xbf16>, vector<32x96xbf16>, vector<8x96xf32> -> vector<8x96xf32>
    %c0_12 = arith.constant 0 : index
    %c0_13 = arith.constant 0 : index
    %28 = vector.load %arg5[%c0_12, %c0_13] : memref<1x96xf32, #tpu.memory_space<vmem>>, vector<1x96xf32>
    %29 = vector.broadcast %28 : vector<1x96xf32> to vector<8x96xf32>
    %30 = arith.addf %27, %29 : vector<8x96xf32>
    %31 = vector.extract_strided_slice %30 {offsets = [0, 0], sizes = [8, 32], strides = [1, 1]} : vector<8x96xf32> to vector<8x32xf32>
    %c0_14 = arith.constant 0 : index
    %c0_15 = arith.constant 0 : index
    %c0_16 = arith.constant 0 : index
    %32 = vector.load %arg6[%c0_14, %c0_15, %c0_16] : memref<3x8x32xf32, #tpu.memory_space<vmem>>, vector<1x8x32xf32>
    %33 = vector.shape_cast %32 : vector<1x8x32xf32> to vector<8x32xf32>
    %34 = vector.shape_cast %31 : vector<8x32xf32> to vector<1x8x32xf32>
    tpu.vector_store %arg6[%c0_14, %c0_15, %c0_16], %34 {strides = array<i32>} : memref<3x8x32xf32, #tpu.memory_space<vmem>>, vector<1x8x32xf32>,
    %35 = vector.extract_strided_slice %30 {offsets = [0, 32], sizes = [8, 32], strides = [1, 1]} : vector<8x96xf32> to vector<8x32xf32>
    %c1 = arith.constant 1 : index
    %c0_17 = arith.constant 0 : index
    %c0_18 = arith.constant 0 : index
    %36 = vector.load %arg6[%c1, %c0_17, %c0_18] : memref<3x8x32xf32, #tpu.memory_space<vmem>>, vector<1x8x32xf32>
    %37 = vector.shape_cast %36 : vector<1x8x32xf32> to vector<8x32xf32>
    %38 = vector.shape_cast %35 : vector<8x32xf32> to vector<1x8x32xf32>
    tpu.vector_store %arg6[%c1, %c0_17, %c0_18], %38 {strides = array<i32>} : memref<3x8x32xf32, #tpu.memory_space<vmem>>, vector<1x8x32xf32>,
    %39 = vector.extract_strided_slice %30 {offsets = [0, 64], sizes = [8, 32], strides = [1, 1]} : vector<8x96xf32> to vector<8x32xf32>
    %c2 = arith.constant 2 : index
    %c0_19 = arith.constant 0 : index
    %c0_20 = arith.constant 0 : index
    %40 = vector.load %arg6[%c2, %c0_19, %c0_20] : memref<3x8x32xf32, #tpu.memory_space<vmem>>, vector<1x8x32xf32>
    %41 = vector.shape_cast %40 : vector<1x8x32xf32> to vector<8x32xf32>
    %42 = vector.shape_cast %39 : vector<8x32xf32> to vector<1x8x32xf32>
    tpu.vector_store %arg6[%c2, %c0_19, %c0_20], %42 {strides = array<i32>} : memref<3x8x32xf32, #tpu.memory_space<vmem>>, vector<1x8x32xf32>,
    return
  }
  func.func @transform_0(%arg0: i32) -> (i32, i32) {
    %c0_i32 = arith.constant 0 : i32
    %c0_i32_0 = arith.constant 0 : i32
    return %arg0, %c0_i32 : i32, i32
  }
  func.func @transform_1(%arg0: i32) -> (i32, i32) {
    %c0_i32 = arith.constant 0 : i32
    %c0_i32_0 = arith.constant 0 : i32
    %c0_i32_1 = arith.constant 0 : i32
    return %c0_i32, %c0_i32_0 : i32, i32
  }
  func.func @transform_2(%arg0: i32) -> (i32, i32) {
    %c0_i32 = arith.constant 0 : i32
    %c0_i32_0 = arith.constant 0 : i32
    %c0_i32_1 = arith.constant 0 : i32
    return %c0_i32, %c0_i32_0 : i32, i32
  }
  func.func @transform_3(%arg0: i32) -> (i32, i32) {
    %c0_i32 = arith.constant 0 : i32
    %c0_i32_0 = arith.constant 0 : i32
    %c0_i32_1 = arith.constant 0 : i32
    return %c0_i32, %c0_i32_0 : i32, i32
  }
  func.func @transform_4(%arg0: i32) -> (i32, i32) {
    %c0_i32 = arith.constant 0 : i32
    %c0_i32_0 = arith.constant 0 : i32
    %c0_i32_1 = arith.constant 0 : i32
    return %c0_i32, %c0_i32_0 : i32, i32
  }
  func.func @transform_5(%arg0: i32) -> (i32, i32, i32) {
    %c0_i32 = arith.constant 0 : i32
    %c0_i32_0 = arith.constant 0 : i32
    %c0_i32_1 = arith.constant 0 : i32
    return %c0_i32, %arg0, %c0_i32_0 : i32, i32, i32
  }
}

module attributes {stable_mosaic.version = 11 : i64} {
  func.func @_ln_qkv_kernel(%arg0: i32, %arg1: memref<8x32xf32, #tpu.memory_space<vmem>>, %arg2: memref<1x32xf32, #tpu.memory_space<vmem>>, %arg3: memref<1x32xf32, #tpu.memory_space<vmem>>, %arg4: memref<32x96xbf16, #tpu.memory_space<vmem>>, %arg5: memref<1x96xf32, #tpu.memory_space<vmem>>, %arg6: memref<3x8x32xf32, #tpu.memory_space<vmem>>) attributes {dimension_semantics = [#tpu.dimension_semantics<parallel>], iteration_bounds = array<i64: 2>, scalar_prefetch = 0 : i64, scratch_operands = 0 : i64, tpu.core_type = #tpu.core_type<tc>, window_params = [{transform_indices = @transform_0, window_bounds = array<i64: 8, 32>}, {pipeline_mode = #tpu.pipeline_mode<synchronous>, transform_indices = @transform_1, window_bounds = array<i64: 1, 32>}, {pipeline_mode = #tpu.pipeline_mode<synchronous>, transform_indices = @transform_2, window_bounds = array<i64: 1, 32>}, {pipeline_mode = #tpu.pipeline_mode<synchronous>, transform_indices = @transform_3, window_bounds = array<i64: 32, 96>}, {pipeline_mode = #tpu.pipeline_mode<synchronous>, transform_indices = @transform_4, window_bounds = array<i64: 1, 96>}, {transform_indices = @transform_5, window_bounds = array<i64: 3, 8, 32>}]} {
    %c0 = arith.constant 0 : index
    %c0_0 = arith.constant 0 : index
    %0 = vector.load %arg1[%c0, %c0_0] : memref<8x32xf32, #tpu.memory_space<vmem>>, vector<8x32xf32>
    %cst = arith.constant dense<0.000000e+00> : vector<8xf32>
    %1 = vector.multi_reduction <add>, %0, %cst [1] : vector<8x32xf32> to vector<8xf32>
    %2 = vector.shape_cast %1 : vector<8xf32> to vector<8x1xf32>
    %cst_1 = arith.constant 3.200000e+01 : f32
    %3 = vector.broadcast %cst_1 : f32 to vector<8x1xf32>
    %4 = arith.divf %2, %3 : vector<8x1xf32>
    %5 = vector.broadcast %4 : vector<8x1xf32> to vector<8x32xf32>
    %6 = arith.subf %0, %5 : vector<8x32xf32>
    %7 = arith.mulf %6, %6 : vector<8x32xf32>
    %cst_2 = arith.constant dense<0.000000e+00> : vector<8xf32>
    %8 = vector.multi_reduction <add>, %7, %cst_2 [1] : vector<8x32xf32> to vector<8xf32>
    %9 = vector.shape_cast %8 : vector<8xf32> to vector<8x1xf32>
    %cst_3 = arith.constant 3.200000e+01 : f32
    %10 = vector.broadcast %cst_3 : f32 to vector<8x1xf32>
    %11 = arith.divf %9, %10 : vector<8x1xf32>
    %12 = vector.broadcast %4 : vector<8x1xf32> to vector<8x32xf32>
    %13 = arith.subf %0, %12 : vector<8x32xf32>
    %cst_4 = arith.constant 9.99999974E-6 : f32
    %14 = vector.broadcast %cst_4 : f32 to vector<8x1xf32>
    %15 = arith.addf %11, %14 : vector<8x1xf32>
    %16 = math.rsqrt %15 : vector<8x1xf32>
    %17 = vector.broadcast %16 : vector<8x1xf32> to vector<8x32xf32>
    %18 = arith.mulf %13, %17 : vector<8x32xf32>
    %c0_5 = arith.constant 0 : index
    %c0_6 = arith.constant 0 : index
    %19 = vector.load %arg2[%c0_5, %c0_6] : memref<1x32xf32, #tpu.memory_space<vmem>>, vector<1x32xf32>
    %20 = vector.broadcast %19 : vector<1x32xf32> to vector<8x32xf32>
    %21 = arith.mulf %18, %20 : vector<8x32xf32>
    %c0_7 = arith.constant 0 : index
    %c0_8 = arith.constant 0 : index
    %22 = vector.load %arg3[%c0_7, %c0_8] : memref<1x32xf32, #tpu.memory_space<vmem>>, vector<1x32xf32>
    %23 = vector.broadcast %22 : vector<1x32xf32> to vector<8x32xf32>
    %24 = arith.addf %21, %23 : vector<8x32xf32>
    %25 = arith.truncf %24 : vector<8x32xf32> to vector<8x32xbf16>
    %c0_9 = arith.constant 0 : index
    %c0_10 = arith.constant 0 : index
    %26 = vector.load %arg4[%c0_9, %c0_10] : memref<32x96xbf16, #tpu.memory_space<vmem>>, vector<32x96xbf16>
    %cst_11 = arith.constant dense<0.000000e+00> : vector<8x96xf32>
    %27 = tpu.matmul %25, %26, %cst_11 {dimension_numbers = #tpu.dot_dimension_numbers<[1], [0], [0], [1], [0, 0, 1, 1], [], []>} : vector<8x32xbf16>, vector<32x96xbf16>, vector<8x96xf32> -> vector<8x96xf32>
    %c0_12 = arith.constant 0 : index
    %c0_13 = arith.constant 0 : index
    %28 = vector.load %arg5[%c0_12, %c0_13] : memref<1x96xf32, #tpu.memory_space<vmem>>, vector<1x96xf32>
    %29 = vector.broadcast %28 : vector<1x96xf32> to vector<8x96xf32>
    %30 = arith.addf %27, %29 : vector<8x96xf32>
    %31 = vector.extract_strided_slice %30 {offsets = [0, 0], sizes = [8, 32], strides = [1, 1]} : vector<8x96xf32> to vector<8x32xf32>
    %c0_14 = arith.constant 0 : index
    %c0_15 = arith.constant 0 : index
    %c0_16 = arith.constant 0 : index
    %32 = vector.load %arg6[%c0_14, %c0_15, %c0_16] : memref<3x8x32xf32, #tpu.memory_space<vmem>>, vector<1x8x32xf32>
    %33 = vector.shape_cast %32 : vector<1x8x32xf32> to vector<8x32xf32>
    %34 = vector.shape_cast %31 : vector<8x32xf32> to vector<1x8x32xf32>
    tpu.vector_store %arg6[%c0_14, %c0_15, %c0_16], %34 {strides = array<i32>} : memref<3x8x32xf32, #tpu.memory_space<vmem>>, vector<1x8x32xf32>,
    %35 = vector.extract_strided_slice %30 {offsets = [0, 32], sizes = [8, 32], strides = [1, 1]} : vector<8x96xf32> to vector<8x32xf32>
    %c1 = arith.constant 1 : index
    %c0_17 = arith.constant 0 : index
    %c0_18 = arith.constant 0 : index
    %36 = vector.load %arg6[%c1, %c0_17, %c0_18] : memref<3x8x32xf32, #tpu.memory_space<vmem>>, vector<1x8x32xf32>
    %37 = vector.shape_cast %36 : vector<1x8x32xf32> to vector<8x32xf32>
    %38 = vector.shape_cast %35 : vector<8x32xf32> to vector<1x8x32xf32>
    tpu.vector_store %arg6[%c1, %c0_17, %c0_18], %38 {strides = array<i32>} : memref<3x8x32xf32, #tpu.memory_space<vmem>>, vector<1x8x32xf32>,
    %39 = vector.extract_strided_slice %30 {offsets = [0, 64], sizes = [8, 32], strides = [1, 1]} : vector<8x96xf32> to vector<8x32xf32>
    %c2 = arith.constant 2 : index
    %c0_19 = arith.constant 0 : index
    %c0_20 = arith.constant 0 : index
    %40 = vector.load %arg6[%c2, %c0_19, %c0_20] : memref<3x8x32xf32, #tpu.memory_space<vmem>>, vector<1x8x32xf32>
    %41 = vector.shape_cast %40 : vector<1x8x32xf32> to vector<8x32xf32>
    %42 = vector.shape_cast %39 : vector<8x32xf32> to vector<1x8x32xf32>
    tpu.vector_store %arg6[%c2, %c0_19, %c0_20], %42 {strides = array<i32>} : memref<3x8x32xf32, #tpu.memory_space<vmem>>, vector<1x8x32xf32>,
    return
  }
  func.func @transform_0(%arg0: i32) -> (i32, i32) {
    %c0_i32 = arith.constant 0 : i32
    %c0_i32_0 = arith.constant 0 : i32
    return %arg0, %c0_i32 : i32, i32
  }
  func.func @transform_1(%arg0: i32) -> (i32, i32) {
    %c0_i32 = arith.constant 0 : i32
    %c0_i32_0 = arith.constant 0 : i32
    %c0_i32_1 = arith.constant 0 : i32
    return %c0_i32, %c0_i32_0 : i32, i32
  }
  func.func @transform_2(%arg0: i32) -> (i32, i32) {
    %c0_i32 = arith.constant 0 : i32
    %c0_i32_0 = arith.constant 0 : i32
    %c0_i32_1 = arith.constant 0 : i32
    return %c0_i32, %c0_i32_0 : i32, i32
  }
  func.func @transform_3(%arg0: i32) -> (i32, i32) {
    %c0_i32 = arith.constant 0 : i32
    %c0_i32_0 = arith.constant 0 : i32
    %c0_i32_1 = arith.constant 0 : i32
    return %c0_i32, %c0_i32_0 : i32, i32
  }
  func.func @transform_4(%arg0: i32) -> (i32, i32) {
    %c0_i32 = arith.constant 0 : i32
    %c0_i32_0 = arith.constant 0 : i32
    %c0_i32_1 = arith.constant 0 : i32
    return %c0_i32, %c0_i32_0 : i32, i32
  }
  func.func @transform_5(%arg0: i32) -> (i32, i32, i32) {
    %c0_i32 = arith.constant 0 : i32
    %c0_i32_0 = arith.constant 0 : i32
    %c0_i32_1 = arith.constant 0 : i32
    return %c0_i32, %arg0, %c0_i32_0 : i32, i32, i32
  }
}

module attributes {stable_mosaic.version = 11 : i64} {
  func.func @_attn_kernel(%arg0: i32, %arg1: memref<1x1x8x32xf32, #tpu.memory_space<vmem>>, %arg2: memref<1x1x8x32xf32, #tpu.memory_space<vmem>>, %arg3: memref<1x1x8x32xf32, #tpu.memory_space<vmem>>, %arg4: memref<8x8xf32, #tpu.memory_space<vmem>>, %arg5: memref<1x8x32xf32, #tpu.memory_space<vmem>>) attributes {dimension_semantics = [#tpu.dimension_semantics<parallel>], iteration_bounds = array<i64: 2>, scalar_prefetch = 0 : i64, scratch_operands = 0 : i64, tpu.core_type = #tpu.core_type<tc>, window_params = [{transform_indices = @transform_0, window_bounds = array<i64: 1, 1, 8, 32>}, {transform_indices = @transform_1, window_bounds = array<i64: 1, 1, 8, 32>}, {transform_indices = @transform_2, window_bounds = array<i64: 1, 1, 8, 32>}, {pipeline_mode = #tpu.pipeline_mode<synchronous>, transform_indices = @transform_3, window_bounds = array<i64: 8, 8>}, {transform_indices = @transform_4, window_bounds = array<i64: 1, 8, 32>}]} {
    %c0 = arith.constant 0 : index
    %c0_0 = arith.constant 0 : index
    %c0_1 = arith.constant 0 : index
    %c0_2 = arith.constant 0 : index
    %0 = vector.load %arg1[%c0, %c0_0, %c0_1, %c0_2] : memref<1x1x8x32xf32, #tpu.memory_space<vmem>>, vector<1x1x8x32xf32>
    %1 = vector.shape_cast %0 : vector<1x1x8x32xf32> to vector<8x32xf32>
    %2 = arith.truncf %1 : vector<8x32xf32> to vector<8x32xbf16>
    %c0_3 = arith.constant 0 : index
    %c0_4 = arith.constant 0 : index
    %c0_5 = arith.constant 0 : index
    %c0_6 = arith.constant 0 : index
    %3 = vector.load %arg2[%c0_3, %c0_4, %c0_5, %c0_6] : memref<1x1x8x32xf32, #tpu.memory_space<vmem>>, vector<1x1x8x32xf32>
    %4 = vector.shape_cast %3 : vector<1x1x8x32xf32> to vector<8x32xf32>
    %5 = arith.truncf %4 : vector<8x32xf32> to vector<8x32xbf16>
    %c0_7 = arith.constant 0 : index
    %c0_8 = arith.constant 0 : index
    %c0_9 = arith.constant 0 : index
    %c0_10 = arith.constant 0 : index
    %6 = vector.load %arg3[%c0_7, %c0_8, %c0_9, %c0_10] : memref<1x1x8x32xf32, #tpu.memory_space<vmem>>, vector<1x1x8x32xf32>
    %7 = vector.shape_cast %6 : vector<1x1x8x32xf32> to vector<8x32xf32>
    %8 = arith.truncf %7 : vector<8x32xf32> to vector<8x32xbf16>
    %c0_11 = arith.constant 0 : index
    %c0_12 = arith.constant 0 : index
    %9 = vector.load %arg4[%c0_11, %c0_12] : memref<8x8xf32, #tpu.memory_space<vmem>>, vector<8x8xf32>
    %10 = vector.extract_strided_slice %2 {offsets = [0, 0], sizes = [8, 8], strides = [1, 1]} : vector<8x32xbf16> to vector<8x8xbf16>
    %11 = vector.extract_strided_slice %5 {offsets = [0, 0], sizes = [8, 8], strides = [1, 1]} : vector<8x32xbf16> to vector<8x8xbf16>
    %cst = arith.constant dense<0.000000e+00> : vector<8x8xf32>
    %12 = tpu.matmul %10, %11, %cst {dimension_numbers = #tpu.dot_dimension_numbers<[1], [1], [0], [0], [0, 0, 1, 0], [], []>} : vector<8x8xbf16>, vector<8x8xbf16>, vector<8x8xf32> -> vector<8x8xf32>
    %13 = arith.addf %12, %9 : vector<8x8xf32>
    %cst_13 = arith.constant dense<0xFF800000> : vector<8xf32>
    %14 = vector.multi_reduction <maximumf>, %13, %cst_13 [1] : vector<8x8xf32> to vector<8xf32>
    %15 = vector.shape_cast %14 : vector<8xf32> to vector<8x1xf32>
    %16 = vector.broadcast %15 : vector<8x1xf32> to vector<8x8xf32>
    %17 = arith.subf %13, %16 : vector<8x8xf32>
    %18 = math.exp %17 : vector<8x8xf32>
    %cst_14 = arith.constant dense<0.000000e+00> : vector<8xf32>
    %19 = vector.multi_reduction <add>, %18, %cst_14 [1] : vector<8x8xf32> to vector<8xf32>
    %20 = vector.shape_cast %19 : vector<8xf32> to vector<8x1xf32>
    %21 = arith.truncf %18 : vector<8x8xf32> to vector<8x8xbf16>
    %22 = vector.extract_strided_slice %8 {offsets = [0, 0], sizes = [8, 8], strides = [1, 1]} : vector<8x32xbf16> to vector<8x8xbf16>
    %cst_15 = arith.constant dense<0.000000e+00> : vector<8x8xf32>
    %23 = tpu.matmul %21, %22, %cst_15 {dimension_numbers = #tpu.dot_dimension_numbers<[1], [0], [0], [1], [0, 0, 1, 1], [], []>} : vector<8x8xbf16>, vector<8x8xbf16>, vector<8x8xf32> -> vector<8x8xf32>
    %24 = tpu.reciprocal %20 {approx = true} : vector<8x1xf32> -> vector<8x1xf32>
    %25 = vector.broadcast %24 : vector<8x1xf32> to vector<8x8xf32>
    %26 = arith.mulf %23, %25 : vector<8x8xf32>
    %27 = vector.extract_strided_slice %2 {offsets = [0, 8], sizes = [8, 8], strides = [1, 1]} : vector<8x32xbf16> to vector<8x8xbf16>
    %28 = vector.extract_strided_slice %5 {offsets = [0, 8], sizes = [8, 8], strides = [1, 1]} : vector<8x32xbf16> to vector<8x8xbf16>
    %cst_16 = arith.constant dense<0.000000e+00> : vector<8x8xf32>
    %29 = tpu.matmul %27, %28, %cst_16 {dimension_numbers = #tpu.dot_dimension_numbers<[1], [1], [0], [0], [0, 0, 1, 0], [], []>} : vector<8x8xbf16>, vector<8x8xbf16>, vector<8x8xf32> -> vector<8x8xf32>
    %30 = arith.addf %29, %9 : vector<8x8xf32>
    %cst_17 = arith.constant dense<0xFF800000> : vector<8xf32>
    %31 = vector.multi_reduction <maximumf>, %30, %cst_17 [1] : vector<8x8xf32> to vector<8xf32>
    %32 = vector.shape_cast %31 : vector<8xf32> to vector<8x1xf32>
    %33 = vector.broadcast %32 : vector<8x1xf32> to vector<8x8xf32>
    %34 = arith.subf %30, %33 : vector<8x8xf32>
    %35 = math.exp %34 : vector<8x8xf32>
    %cst_18 = arith.constant dense<0.000000e+00> : vector<8xf32>
    %36 = vector.multi_reduction <add>, %35, %cst_18 [1] : vector<8x8xf32> to vector<8xf32>
    %37 = vector.shape_cast %36 : vector<8xf32> to vector<8x1xf32>
    %38 = arith.truncf %35 : vector<8x8xf32> to vector<8x8xbf16>
    %39 = vector.extract_strided_slice %8 {offsets = [0, 8], sizes = [8, 8], strides = [1, 1]} : vector<8x32xbf16> to vector<8x8xbf16>
    %cst_19 = arith.constant dense<0.000000e+00> : vector<8x8xf32>
    %40 = tpu.matmul %38, %39, %cst_19 {dimension_numbers = #tpu.dot_dimension_numbers<[1], [0], [0], [1], [0, 0, 1, 1], [], []>} : vector<8x8xbf16>, vector<8x8xbf16>, vector<8x8xf32> -> vector<8x8xf32>
    %41 = tpu.reciprocal %37 {approx = true} : vector<8x1xf32> -> vector<8x1xf32>
    %42 = vector.broadcast %41 : vector<8x1xf32> to vector<8x8xf32>
    %43 = arith.mulf %40, %42 : vector<8x8xf32>
    %44 = vector.extract_strided_slice %2 {offsets = [0, 16], sizes = [8, 8], strides = [1, 1]} : vector<8x32xbf16> to vector<8x8xbf16>
    %45 = vector.extract_strided_slice %5 {offsets = [0, 16], sizes = [8, 8], strides = [1, 1]} : vector<8x32xbf16> to vector<8x8xbf16>
    %cst_20 = arith.constant dense<0.000000e+00> : vector<8x8xf32>
    %46 = tpu.matmul %44, %45, %cst_20 {dimension_numbers = #tpu.dot_dimension_numbers<[1], [1], [0], [0], [0, 0, 1, 0], [], []>} : vector<8x8xbf16>, vector<8x8xbf16>, vector<8x8xf32> -> vector<8x8xf32>
    %47 = arith.addf %46, %9 : vector<8x8xf32>
    %cst_21 = arith.constant dense<0xFF800000> : vector<8xf32>
    %48 = vector.multi_reduction <maximumf>, %47, %cst_21 [1] : vector<8x8xf32> to vector<8xf32>
    %49 = vector.shape_cast %48 : vector<8xf32> to vector<8x1xf32>
    %50 = vector.broadcast %49 : vector<8x1xf32> to vector<8x8xf32>
    %51 = arith.subf %47, %50 : vector<8x8xf32>
    %52 = math.exp %51 : vector<8x8xf32>
    %cst_22 = arith.constant dense<0.000000e+00> : vector<8xf32>
    %53 = vector.multi_reduction <add>, %52, %cst_22 [1] : vector<8x8xf32> to vector<8xf32>
    %54 = vector.shape_cast %53 : vector<8xf32> to vector<8x1xf32>
    %55 = arith.truncf %52 : vector<8x8xf32> to vector<8x8xbf16>
    %56 = vector.extract_strided_slice %8 {offsets = [0, 16], sizes = [8, 8], strides = [1, 1]} : vector<8x32xbf16> to vector<8x8xbf16>
    %cst_23 = arith.constant dense<0.000000e+00> : vector<8x8xf32>
    %57 = tpu.matmul %55, %56, %cst_23 {dimension_numbers = #tpu.dot_dimension_numbers<[1], [0], [0], [1], [0, 0, 1, 1], [], []>} : vector<8x8xbf16>, vector<8x8xbf16>, vector<8x8xf32> -> vector<8x8xf32>
    %58 = tpu.reciprocal %54 {approx = true} : vector<8x1xf32> -> vector<8x1xf32>
    %59 = vector.broadcast %58 : vector<8x1xf32> to vector<8x8xf32>
    %60 = arith.mulf %57, %59 : vector<8x8xf32>
    %61 = vector.extract_strided_slice %2 {offsets = [0, 24], sizes = [8, 8], strides = [1, 1]} : vector<8x32xbf16> to vector<8x8xbf16>
    %62 = vector.extract_strided_slice %5 {offsets = [0, 24], sizes = [8, 8], strides = [1, 1]} : vector<8x32xbf16> to vector<8x8xbf16>
    %cst_24 = arith.constant dense<0.000000e+00> : vector<8x8xf32>
    %63 = tpu.matmul %61, %62, %cst_24 {dimension_numbers = #tpu.dot_dimension_numbers<[1], [1], [0], [0], [0, 0, 1, 0], [], []>} : vector<8x8xbf16>, vector<8x8xbf16>, vector<8x8xf32> -> vector<8x8xf32>
    %64 = arith.addf %63, %9 : vector<8x8xf32>
    %cst_25 = arith.constant dense<0xFF800000> : vector<8xf32>
    %65 = vector.multi_reduction <maximumf>, %64, %cst_25 [1] : vector<8x8xf32> to vector<8xf32>
    %66 = vector.shape_cast %65 : vector<8xf32> to vector<8x1xf32>
    %67 = vector.broadcast %66 : vector<8x1xf32> to vector<8x8xf32>
    %68 = arith.subf %64, %67 : vector<8x8xf32>
    %69 = math.exp %68 : vector<8x8xf32>
    %cst_26 = arith.constant dense<0.000000e+00> : vector<8xf32>
    %70 = vector.multi_reduction <add>, %69, %cst_26 [1] : vector<8x8xf32> to vector<8xf32>
    %71 = vector.shape_cast %70 : vector<8xf32> to vector<8x1xf32>
    %72 = arith.truncf %69 : vector<8x8xf32> to vector<8x8xbf16>
    %73 = vector.extract_strided_slice %8 {offsets = [0, 24], sizes = [8, 8], strides = [1, 1]} : vector<8x32xbf16> to vector<8x8xbf16>
    %cst_27 = arith.constant dense<0.000000e+00> : vector<8x8xf32>
    %74 = tpu.matmul %72, %73, %cst_27 {dimension_numbers = #tpu.dot_dimension_numbers<[1], [0], [0], [1], [0, 0, 1, 1], [], []>} : vector<8x8xbf16>, vector<8x8xbf16>, vector<8x8xf32> -> vector<8x8xf32>
    %75 = tpu.reciprocal %71 {approx = true} : vector<8x1xf32> -> vector<8x1xf32>
    %76 = vector.broadcast %75 : vector<8x1xf32> to vector<8x8xf32>
    %77 = arith.mulf %74, %76 : vector<8x8xf32>
    %78 = tpu.concatenate %26, %43, %60, %77 in 1 : vector<8x8xf32>, vector<8x8xf32>, vector<8x8xf32>, vector<8x8xf32> -> vector<8x32xf32>
    %c0_28 = arith.constant 0 : index
    %c0_29 = arith.constant 0 : index
    %c0_30 = arith.constant 0 : index
    %79 = vector.load %arg5[%c0_28, %c0_29, %c0_30] : memref<1x8x32xf32, #tpu.memory_space<vmem>>, vector<1x8x32xf32>
    %80 = vector.shape_cast %79 : vector<1x8x32xf32> to vector<8x32xf32>
    %81 = vector.shape_cast %78 : vector<8x32xf32> to vector<1x8x32xf32>
    tpu.vector_store %arg5[%c0_28, %c0_29, %c0_30], %81 {strides = array<i32>} : memref<1x8x32xf32, #tpu.memory_space<vmem>>, vector<1x8x32xf32>,
    return
  }
  func.func @transform_0(%arg0: i32) -> (i32, i32, i32, i32) {
    %c0_i32 = arith.constant 0 : i32
    %c0_i32_0 = arith.constant 0 : i32
    %c0_i32_1 = arith.constant 0 : i32
    %c0_i32_2 = arith.constant 0 : i32
    return %c0_i32, %arg0, %c0_i32_0, %c0_i32_1 : i32, i32, i32, i32
  }
  func.func @transform_1(%arg0: i32) -> (i32, i32, i32, i32) {
    %c1_i32 = arith.constant 1 : i32
    %c0_i32 = arith.constant 0 : i32
    %c0_i32_0 = arith.constant 0 : i32
    %c0_i32_1 = arith.constant 0 : i32
    return %c1_i32, %arg0, %c0_i32, %c0_i32_0 : i32, i32, i32, i32
  }
  func.func @transform_2(%arg0: i32) -> (i32, i32, i32, i32) {
    %c2_i32 = arith.constant 2 : i32
    %c0_i32 = arith.constant 0 : i32
    %c0_i32_0 = arith.constant 0 : i32
    %c0_i32_1 = arith.constant 0 : i32
    return %c2_i32, %arg0, %c0_i32, %c0_i32_0 : i32, i32, i32, i32
  }
  func.func @transform_3(%arg0: i32) -> (i32, i32) {
    %c0_i32 = arith.constant 0 : i32
    %c0_i32_0 = arith.constant 0 : i32
    %c0_i32_1 = arith.constant 0 : i32
    return %c0_i32, %c0_i32_0 : i32, i32
  }
  func.func @transform_4(%arg0: i32) -> (i32, i32, i32) {
    %c0_i32 = arith.constant 0 : i32
    %c0_i32_0 = arith.constant 0 : i32
    %c0_i32_1 = arith.constant 0 : i32
    return %arg0, %c0_i32, %c0_i32_0 : i32, i32, i32
  }
}

module attributes {stable_mosaic.version = 11 : i64} {
  func.func @_ln_ffn_residual_kernel(%arg0: i32, %arg1: memref<8x32xf32, #tpu.memory_space<vmem>>, %arg2: memref<1x32xf32, #tpu.memory_space<vmem>>, %arg3: memref<1x32xf32, #tpu.memory_space<vmem>>, %arg4: memref<32x64xbf16, #tpu.memory_space<vmem>>, %arg5: memref<1x64xf32, #tpu.memory_space<vmem>>, %arg6: memref<64x32xbf16, #tpu.memory_space<vmem>>, %arg7: memref<1x32xf32, #tpu.memory_space<vmem>>, %arg8: memref<8x32xf32, #tpu.memory_space<vmem>>) attributes {dimension_semantics = [#tpu.dimension_semantics<parallel>], iteration_bounds = array<i64: 2>, scalar_prefetch = 0 : i64, scratch_operands = 0 : i64, tpu.core_type = #tpu.core_type<tc>, window_params = [{transform_indices = @transform_0, window_bounds = array<i64: 8, 32>}, {pipeline_mode = #tpu.pipeline_mode<synchronous>, transform_indices = @transform_1, window_bounds = array<i64: 1, 32>}, {pipeline_mode = #tpu.pipeline_mode<synchronous>, transform_indices = @transform_2, window_bounds = array<i64: 1, 32>}, {pipeline_mode = #tpu.pipeline_mode<synchronous>, transform_indices = @transform_3, window_bounds = array<i64: 32, 64>}, {pipeline_mode = #tpu.pipeline_mode<synchronous>, transform_indices = @transform_4, window_bounds = array<i64: 1, 64>}, {pipeline_mode = #tpu.pipeline_mode<synchronous>, transform_indices = @transform_5, window_bounds = array<i64: 64, 32>}, {pipeline_mode = #tpu.pipeline_mode<synchronous>, transform_indices = @transform_6, window_bounds = array<i64: 1, 32>}, {transform_indices = @transform_7, window_bounds = array<i64: 8, 32>}]} {
    %c0 = arith.constant 0 : index
    %c0_0 = arith.constant 0 : index
    %0 = vector.load %arg1[%c0, %c0_0] : memref<8x32xf32, #tpu.memory_space<vmem>>, vector<8x32xf32>
    %cst = arith.constant dense<0.000000e+00> : vector<8xf32>
    %1 = vector.multi_reduction <add>, %0, %cst [1] : vector<8x32xf32> to vector<8xf32>
    %2 = vector.shape_cast %1 : vector<8xf32> to vector<8x1xf32>
    %cst_1 = arith.constant 3.200000e+01 : f32
    %3 = vector.broadcast %cst_1 : f32 to vector<8x1xf32>
    %4 = arith.divf %2, %3 : vector<8x1xf32>
    %5 = vector.broadcast %4 : vector<8x1xf32> to vector<8x32xf32>
    %6 = arith.subf %0, %5 : vector<8x32xf32>
    %7 = arith.mulf %6, %6 : vector<8x32xf32>
    %cst_2 = arith.constant dense<0.000000e+00> : vector<8xf32>
    %8 = vector.multi_reduction <add>, %7, %cst_2 [1] : vector<8x32xf32> to vector<8xf32>
    %9 = vector.shape_cast %8 : vector<8xf32> to vector<8x1xf32>
    %cst_3 = arith.constant 3.200000e+01 : f32
    %10 = vector.broadcast %cst_3 : f32 to vector<8x1xf32>
    %11 = arith.divf %9, %10 : vector<8x1xf32>
    %12 = vector.broadcast %4 : vector<8x1xf32> to vector<8x32xf32>
    %13 = arith.subf %0, %12 : vector<8x32xf32>
    %cst_4 = arith.constant 9.99999974E-6 : f32
    %14 = vector.broadcast %cst_4 : f32 to vector<8x1xf32>
    %15 = arith.addf %11, %14 : vector<8x1xf32>
    %16 = math.rsqrt %15 : vector<8x1xf32>
    %17 = vector.broadcast %16 : vector<8x1xf32> to vector<8x32xf32>
    %18 = arith.mulf %13, %17 : vector<8x32xf32>
    %c0_5 = arith.constant 0 : index
    %c0_6 = arith.constant 0 : index
    %19 = vector.load %arg2[%c0_5, %c0_6] : memref<1x32xf32, #tpu.memory_space<vmem>>, vector<1x32xf32>
    %20 = vector.broadcast %19 : vector<1x32xf32> to vector<8x32xf32>
    %21 = arith.mulf %18, %20 : vector<8x32xf32>
    %c0_7 = arith.constant 0 : index
    %c0_8 = arith.constant 0 : index
    %22 = vector.load %arg3[%c0_7, %c0_8] : memref<1x32xf32, #tpu.memory_space<vmem>>, vector<1x32xf32>
    %23 = vector.broadcast %22 : vector<1x32xf32> to vector<8x32xf32>
    %24 = arith.addf %21, %23 : vector<8x32xf32>
    %25 = arith.truncf %24 : vector<8x32xf32> to vector<8x32xbf16>
    %c0_9 = arith.constant 0 : index
    %c0_10 = arith.constant 0 : index
    %26 = vector.load %arg4[%c0_9, %c0_10] : memref<32x64xbf16, #tpu.memory_space<vmem>>, vector<32x64xbf16>
    %cst_11 = arith.constant dense<0.000000e+00> : vector<8x64xf32>
    %27 = tpu.matmul %25, %26, %cst_11 {dimension_numbers = #tpu.dot_dimension_numbers<[1], [0], [0], [1], [0, 0, 1, 1], [], []>} : vector<8x32xbf16>, vector<32x64xbf16>, vector<8x64xf32> -> vector<8x64xf32>
    %c0_12 = arith.constant 0 : index
    %c0_13 = arith.constant 0 : index
    %28 = vector.load %arg5[%c0_12, %c0_13] : memref<1x64xf32, #tpu.memory_space<vmem>>, vector<1x64xf32>
    %29 = vector.broadcast %28 : vector<1x64xf32> to vector<8x64xf32>
    %30 = arith.addf %27, %29 : vector<8x64xf32>
    %cst_14 = arith.constant 0.000000e+00 : f32
    %31 = vector.broadcast %cst_14 : f32 to vector<8x64xf32>
    %32 = arith.maximumf %30, %31 : vector<8x64xf32>
    %33 = arith.truncf %32 : vector<8x64xf32> to vector<8x64xbf16>
    %c0_15 = arith.constant 0 : index
    %c0_16 = arith.constant 0 : index
    %34 = vector.load %arg6[%c0_15, %c0_16] : memref<64x32xbf16, #tpu.memory_space<vmem>>, vector<64x32xbf16>
    %cst_17 = arith.constant dense<0.000000e+00> : vector<8x32xf32>
    %35 = tpu.matmul %33, %34, %cst_17 {dimension_numbers = #tpu.dot_dimension_numbers<[1], [0], [0], [1], [0, 0, 1, 1], [], []>} : vector<8x64xbf16>, vector<64x32xbf16>, vector<8x32xf32> -> vector<8x32xf32>
    %c0_18 = arith.constant 0 : index
    %c0_19 = arith.constant 0 : index
    %36 = vector.load %arg7[%c0_18, %c0_19] : memref<1x32xf32, #tpu.memory_space<vmem>>, vector<1x32xf32>
    %37 = vector.broadcast %36 : vector<1x32xf32> to vector<8x32xf32>
    %38 = arith.addf %35, %37 : vector<8x32xf32>
    %39 = arith.addf %38, %0 : vector<8x32xf32>
    %c0_20 = arith.constant 0 : index
    %c0_21 = arith.constant 0 : index
    %40 = vector.load %arg8[%c0_20, %c0_21] : memref<8x32xf32, #tpu.memory_space<vmem>>, vector<8x32xf32>
    tpu.vector_store %arg8[%c0_20, %c0_21], %39 {strides = array<i32>} : memref<8x32xf32, #tpu.memory_space<vmem>>, vector<8x32xf32>,
    return
  }
  func.func @transform_0(%arg0: i32) -> (i32, i32) {
    %c0_i32 = arith.constant 0 : i32
    %c0_i32_0 = arith.constant 0 : i32
    return %arg0, %c0_i32 : i32, i32
  }
  func.func @transform_1(%arg0: i32) -> (i32, i32) {
    %c0_i32 = arith.constant 0 : i32
    %c0_i32_0 = arith.constant 0 : i32
    %c0_i32_1 = arith.constant 0 : i32
    return %c0_i32, %c0_i32_0 : i32, i32
  }
  func.func @transform_2(%arg0: i32) -> (i32, i32) {
    %c0_i32 = arith.constant 0 : i32
    %c0_i32_0 = arith.constant 0 : i32
    %c0_i32_1 = arith.constant 0 : i32
    return %c0_i32, %c0_i32_0 : i32, i32
  }
  func.func @transform_3(%arg0: i32) -> (i32, i32) {
    %c0_i32 = arith.constant 0 : i32
    %c0_i32_0 = arith.constant 0 : i32
    %c0_i32_1 = arith.constant 0 : i32
    return %c0_i32, %c0_i32_0 : i32, i32
  }
  func.func @transform_4(%arg0: i32) -> (i32, i32) {
    %c0_i32 = arith.constant 0 : i32
    %c0_i32_0 = arith.constant 0 : i32
    %c0_i32_1 = arith.constant 0 : i32
    return %c0_i32, %c0_i32_0 : i32, i32
  }
  func.func @transform_5(%arg0: i32) -> (i32, i32) {
    %c0_i32 = arith.constant 0 : i32
    %c0_i32_0 = arith.constant 0 : i32
    %c0_i32_1 = arith.constant 0 : i32
    return %c0_i32, %c0_i32_0 : i32, i32
  }
  func.func @transform_6(%arg0: i32) -> (i32, i32) {
    %c0_i32 = arith.constant 0 : i32
    %c0_i32_0 = arith.constant 0 : i32
    %c0_i32_1 = arith.constant 0 : i32
    return %c0_i32, %c0_i32_0 : i32, i32
  }
  func.func @transform_7(%arg0: i32) -> (i32, i32) {
    %c0_i32 = arith.constant 0 : i32
    %c0_i32_0 = arith.constant 0 : i32
    return %arg0, %c0_i32 : i32, i32
  }
}

</mosaic_0001>

<bundles_post_ra>
// kernel: decoder_layer.8
= control target key start
LH: loop header
LB: loop body
LE: loop exit
PB: predicated region body
PF: predicated region fallthrough
CT: control target
= control target key end

     0   :  { %s629_s12 = smov 0   ;;  %s695_s0 = inlined_call_operand.vmem [shape: f32[3,2,8,32], index: 0, kind: input, shape index: {}, may-alias: {0,1,2}]   ;;  %s696_s1 = inlined_call_operand.vmem [shape: f32[3,2,8,32], index: 1, kind: input, shape index: {}, may-alias: {0,1,2}]   ;;  %s697_s2 = inlined_call_operand.vmem [shape: f32[3,2,8,32], index: 2, kind: input, shape index: {}, may-alias: {0,1,2}]   ;;  %s698_s3 = inlined_call_operand.vmem [shape: f32[2,8,32], index: 3, kind: output, shape index: {}]  }
   0x1 LB: > { %s544_s13 = sadd.s32 4294967295, %s601_s12   ;;  %p548_p0 = scmp.ge.s32.totalorder %s601_s12, 1  ;;  %s601_s12 = sphi %s629_s12, %s13_s12  }
   0x2   : > { %p156_p1 = scmp.lt.s32.totalorder %s601_s12, 3 }
   0x4   : > { %p157_p2 = pnand %p548_p0, %p156_p1 }
   0x5   : > { %p188_p3 = scmp.lt.s32.totalorder (!%p157_p2), %s544_s13, 1  ;;  %s603_s21 = smov (!%p157_p2), 120  }
   0x6   : > { %160 = sbr.rel (%p157_p2) target bundleno = 825 (0x339), region = 32  ;;  %s604_s22 = smov (!%p157_p2), 104  }
   0x7   : > { %s605_s23 = smov (!%p157_p2), 112   ;;  %s606_s27 = smov (!%p157_p2), 8  }
   0x8   : > { %s607_s28 = smov (!%p157_p2), 24   ;;  %s608_s29 = smov (!%p157_p2), 16  }
   0xb   : > { %s700_s13 = smov (!%p188_p3, %s544_s13), 1  ;;  %vm213_vm0 = vcmask 64512   ;;  %vm246_vm1 = vcmask 1043456   ;;  %vm455_vm2 = vcmask 130048   ;;  %vm457_vm3 = vcmask 195584  }
   0xc   : > { %s637_s14 = sshll.u32 %s700_s13, 3  ;;  %vm459_vm4 = vcmask 261120  }
   0xd   : > { %s501_s17 = scalar_lea.vmem %s696_s1, %s637_s14  ;;  %s191_s20 = scalar_lea.vmem %s695_s0, %s637_s14 }
   0xe   : > { %v553_v0 = vld [vmem:[%s501_s17 + $0x10] sm:$0xff]  ;;  %v207_v1 = vld [vmem:[%s191_s20] sm:$0xff]  ;;  %s504_s26 = scalar_lea.vmem %s697_s2, %s637_s14  ;;  %s205_s5 = scalar_lea.vmem %s698_s3, %s637_s14 }
   0xf   : > { %v210_v2 = vpack.c.bf16 %v553_v0, %v553_v0  ;;  %v208_v3 = vpack.c.bf16 %v207_v1, %v207_v1  ;;  %v554_v17 = vld [vmem:[%s504_s26 + $0x20] sm:$0xff] }
  0x10   : > { %v212_v18 = vpack.c.bf16 %v554_v17, %v554_v17 }
  0x11   : > { %v218_v4 = vsel %vm213_vm0, %v210_v2, 0  ;;  %v271_v5 = vunpack.c.l.b16 %v210_v2  ;;  %v266_v6 = vunpack.c.l.b16 %v208_v3 }
  0x12   : > { %227 = vmatpush.bf16.xpose.msra.mxu0 %v218_v4  ;;  %v248_v19 = vsel %vm246_vm1, %v212_v18, 0  ;;  %v305_v21 = vunpack.c.l.b16 %v212_v18 }
  0x13   : > { %v267_v7 = vpack.c.b16 %v266_v6, %v266_v6  ;;  %v272_v8 = vpack.c.b16 %v271_v5, %v271_v5  ;;  %257 = vmatpush.bf16.msra.mxu1 %v248_v19 }
  0x14   : > { %v306_v22 = vpack.c.b16 %v305_v21, %v305_v21 }
  0x15   : > { %268 = vrot.lane.b32.xlu1 %v267_v7, %s603_s21  ;;  %388 = vrot.lane.b32.xlu2 %v272_v8, %s604_s22 }
  0x19   : > { %555 = vmatmul.msk.bf16.vlgmr.msra.gmra.mxu0 %vm213_vm0, %v208_v3 }
  0x1d   : > { %332 = vrot.lane.b32.xlu1 %v272_v8, %s605_s23  ;;  %330 = vrot.lane.b32.xlu2 %v267_v7, %s605_s23 }
  0x25   : > { %386 = vrot.lane.b32.xlu1 %v267_v7, %s604_s22 }
  0x2d   : > { %307 = vrot.lane.b32.xlu1 %v306_v22, %s603_s21 }
  0x6f   : > { %v389_v10 = vpop.permute.xlu2 %388 }
  0x70   : > { %v394_v11 = vsel %vm213_vm0, %v389_v10, 0 }
  0x71   : > { %403 = vmatpush.bf16.xpose.msrb.mxu0 %v394_v11 }
  0x77   : > { %v331_v32 = vpop.permute.xlu2 %330 }
  0x87   : > { %v269_v9 = vpop.permute.xlu1 %268 }
  0x8f   : > { %v333_v12 = vpop.permute.xlu1 %332 }
  0x90   : > { %v338_v20 = vsel %vm213_vm0, %v333_v12, 0 }
  0x91   : > { %347 = vmatpush.bf16.xpose.msrb.mxu1 %v338_v20 }
  0x96   : > { %v229_v13 = vpop.f32.mrf.mxu0 }
  0x97   : > { %v233_v14 = vsel %vm213_vm0, %v229_v13, -inf  ;;  %v387_v15 = vpop.permute.xlu1 %386 }
  0x98   : > { %234 = vmax.xlane.f32.xlu0 %v233_v14  ;;  %561 = vmatmul.msk.bf16.vlgmr.msrb.gmra.mxu0 %vm213_vm0, %v387_v15 }
  0x9e   : > { %v231_v16 = vpop.f32.mrf.mxu0 }
  0x9f   : > { %v308_v43 = vpop.permute.xlu1 %307 }
  0xa0   : > { %v313_v44 = vsel %vm246_vm1, %v308_v43, 0 }
  0xa1   : > { %322 = vmatpush.bf16.msra.mxu3 %v313_v44 }
  0xac   : > { %273 = vrot.lane.b32.xlu0 %v272_v8, %s603_s21 }
 0x10b   : > { %v235_v23 = vpop.xlane.xlu0 %234 }
 0x10c   : > { %v236_v24 = vsub.f32 %v229_v13, %v235_v23 }
 0x10e   : > { %v237_v25 = vmul.f32 1.442695, %v236_v24 }
 0x110   : > { %579 = vpow2.f32 %v237_v25 }
 0x115   : > { %v405_v28 = vpop.f32.mrf.mxu0 }
 0x116   : > { %v580_v26 = vpop.eup %579  ;;  %v409_v33 = vsel %vm213_vm0, %v405_v28, -inf }
 0x117   : > { %v242_v27 = vpack.c.bf16 %v580_v26, %v580_v26  ;;  %410 = vmax.xlane.f32.xlu1 %v409_v33  ;;  %v239_v42 = vsel %vm213_vm0, %v580_v26, 0.0 }
 0x119   : > { %556 = vmatmul.msk.bf16.vlgmr.msra.gmra.mxu1 %vm213_vm0, %v242_v27 }
 0x11d   : > { %v407_v31 = vpop.f32.mrf.mxu0 }
 0x11e   : > { %v274_v29 = vpop.permute.xlu0 %273 }
 0x11f   : > { %v279_v30 = vsel %vm213_vm0, %v274_v29, 0 }
 0x120   : > { %288 = vmatpush.bf16.xpose.msra.mxu2 %v279_v30 }
 0x127   : > { %557 = vmatmul.msk.bf16.vlgmr.msra.gmra.mxu2 %vm213_vm0, %v269_v9 }
 0x129   : > { %559 = vmatmul.msk.bf16.vlgmr.msrb.gmra.mxu1 %vm213_vm0, %v331_v32 }
 0x18a   : > { %v411_v47 = vpop.xlane.xlu1 %410 }
 0x18b   : > { %v412_v50 = vsub.f32 %v405_v28, %v411_v47 }
 0x18d   : > { %v413_v53 = vmul.f32 1.442695, %v412_v50 }
 0x196   : > { %v670_v34 = vpop.f32.mrf.mxu1 }
 0x19e   : > { %v261_v35 = vpop.f32.mrf.mxu1 }
 0x1a6   : > { %v349_v36 = vpop.f32.mrf.mxu1 }
 0x1a7   : > { %v353_v37 = vsel %vm213_vm0, %v349_v36, -inf }
 0x1a8   : > { %354 = vmax.xlane.f32.xlu0 %v353_v37 }
 0x1aa   : > { %v290_v38 = vpop.f32.mrf.mxu2 }
 0x1ab   : > { %v294_v39 = vsel %vm213_vm0, %v290_v38, -inf }
 0x1ac   : > { %295 = vmax.xlane.f32.xlu2 %v294_v39 }
 0x1ae   : > { %v351_v40 = vpop.f32.mrf.mxu1 }
 0x1b2   : > { %v292_v41 = vpop.f32.mrf.mxu2 }
 0x1bc   : > { %419 = vrot.lane.b32.xlu0 %v306_v22, %s604_s22 }
 0x1c4   : > { %363 = vrot.lane.b32.xlu2 %v306_v22, %s605_s23 }
 0x1e6   : > { %240 = vadd.xlane.f32.xlu0 %v239_v42 }
 0x21b   : > { %v355_v45 = vpop.xlane.xlu0 %354 }
 0x21c   : > { %v356_v46 = vsub.f32 %v349_v36, %v355_v45 }
 0x21e   : > { %v357_v48 = vmul.f32 1.442695, %v356_v46 }
 0x21f   : > { %v296_v49 = vpop.xlane.xlu2 %295 }
 0x220   : > { %581 = vpow2.f32 %v357_v48  ;;  %v297_v51 = vsub.f32 %v290_v38, %v296_v49 }
 0x222   : > { %v298_v52 = vmul.f32 1.442695, %v297_v51 }
 0x224   : > { %583 = vpow2.f32 %v298_v52 }
 0x225   : > { %585 = vpow2.f32 %v413_v53 }
 0x226   : > { %v582_v54 = vpop.eup %581 }
 0x227   : > { %v359_v55 = vsel %vm213_vm0, %v582_v54, 0.0  ;;  %v364_v56 = vpop.permute.xlu2 %363  ;;  %v362_v2 = vpack.c.bf16 %v582_v54, %v582_v54 }
 0x228   : > { %360 = vadd.xlane.f32.xlu2 %v359_v55  ;;  %v369_v57 = vsel %vm246_vm1, %v364_v56, 0 }
 0x229   : > { %378 = vmatpush.bf16.msrb.mxu3 %v369_v57 }
 0x22a   : > { %v584_v58 = vpop.eup %583 }
 0x22b   : > { %v300_v59 = vsel %vm213_vm0, %v584_v58, 0.0  ;;  %v303_v60 = vpack.c.bf16 %v584_v58, %v584_v58  ;;  %v586_v61 = vpop.eup %585 }
 0x22c   : > { %301 = vadd.xlane.f32.xlu1 %v300_v59  ;;  %v418_v0 = vpack.c.bf16 %v586_v61, %v586_v61  ;;  %v415_v1 = vsel %vm213_vm0, %v586_v61, 0.0 }
 0x22d   : > { %558 = vmatmul.msk.bf16.vlgmr.msra.gmra.mxu3 %vm213_vm0, %v303_v60 }
 0x22e   : > { %v420_v62 = vpop.permute.xlu0 %419 }
 0x22f   : > { %v425_v63 = vsel %vm246_vm1, %v420_v62, 0 }
 0x230   : > { %434 = vmatpush.bf16.msrb.mxu2 %v425_v63 }
 0x233   : > { %562 = vmatmul.msk.bf16.vlgmr.msrb.gmra.mxu2 %vm213_vm0, %v418_v0 }
 0x234   : > { %416 = vadd.xlane.f32.xlu1 %v415_v1 }
 0x23d   : > { %560 = vmatmul.msk.bf16.vlgmr.msrb.gmra.mxu3 %vm213_vm0, %v362_v2 }
 0x259   : > { %v241_v18 = vpop.xlane.xlu0 %240 }
 0x29b   : > { %v361_v10 = vpop.xlane.xlu2 %360 }
 0x29f   : > { %v302_v3 = vpop.xlane.xlu1 %301 }
 0x2a0   : > { %587 = vrcp.f32 %v302_v3 }
 0x2a6   : > { %v588_v5 = vpop.eup %587 }
 0x2a7   : > { %v417_v4 = vpop.xlane.xlu1 %416 }
 0x2a8   : > { %589 = vrcp.f32 %v417_v4 }
 0x2a9   : > { %591 = vrcp.f32 %v361_v10 }
 0x2aa   : > { %593 = vrcp.f32 %v241_v18 }
 0x2ae   : > { %v590_v8 = vpop.eup %589 }
 0x2af   : > { %v592_v14 = vpop.eup %591 }
 0x2b0   : > { %v324_v6 = vpop.f32.mrf.mxu3  ;;  %v594_v20 = vpop.eup %593 }
 0x2b1   : > { %v329_v7 = vmul.f32 %v588_v5, %v324_v6  ;;  %v264_v21 = vmul.f32 %v594_v20, %v670_v34 }
 0x2b3   : > { %443 = vrot.lane.b32.xlu1 %v329_v7, %s606_s27 }
 0x2b6   : > { %v436_v9 = vpop.f32.mrf.mxu2 }
 0x2b7   : > { %v441_v11 = vmul.f32 %v590_v8, %v436_v9 }
 0x2b8   : > { %v326_v12 = vpop.f32.mrf.mxu3 }
 0x2b9   : > { %451 = vrot.lane.b32.xlu2 %v441_v11, %s607_s28 }
 0x2be   : > { %v438_v13 = vpop.f32.mrf.mxu2 }
 0x2c0   : > { %v380_v15 = vpop.f32.mrf.mxu3 }
 0x2c1   : > { %v385_v16 = vmul.f32 %v592_v14, %v380_v15 }
 0x2c3   : > { %447 = vrot.lane.b32.xlu1 %v385_v16, %s608_s29 }
 0x2c8   : > { %v382_v17 = vpop.f32.mrf.mxu3 }
 0x313   : > { %v452_v24 = vpop.permute.xlu2 %451 }
 0x325   : > { %v444_v19 = vpop.permute.xlu1 %443 }
 0x326   : > { %v454_v22 = vsel %vm213_vm0, %v264_v21, %v444_v19 }
 0x335   : > { %v448_v23 = vpop.permute.xlu1 %447 }
 0x336   : > { %v456_v25 = vsel %vm455_vm2, %v454_v22, %v448_v23 }
 0x337   : > { %v458_v26 = vsel %vm457_vm3, %v456_v25, %v452_v24 }
 0x338   : > { %460 = vst.msk [vmem:[%s205_s5] sm:$0xff] %vm459_vm4, %v458_v26 }
 0x339 PF: > { %s13_s12 = sadd.s32 1, %s601_s12  }
 0x33a   : > { %p10_p4 = scmp.ge.s32.totalorder %s13_s12, 4  }
 0x33c   :  { %12 = sbr.rel (!%p10_p4) target bundleno = 1 (0x1), region = 68 }

// kernel: decoder_layer.9
= control target key start
LH: loop header
LB: loop body
LE: loop exit
PB: predicated region body
PF: predicated region fallthrough
CT: control target
= control target key end

     0   :  { %9 = vsyncpa [#allocation3], 0  ;;  %s462_s15 = smov 0   ;;  %s488_s0 = inlined_call_operand.vmem [shape: f32[16,32], index: 0, kind: input, shape index: {}]   ;;  %s489_s1 = inlined_call_operand.hbm [shape: bf16[32,32], index: 1, kind: input, shape index: {}]   ;;  %s490_s2 = inlined_call_operand.vmem [shape: f32[1,32], index: 2, kind: input, shape index: {}]   ;;  %s491_s3 = inlined_call_operand.vmem [shape: f32[16,32], index: 3, kind: input, shape index: {}]   ;;  %s492_s4 = inlined_call_operand.vmem [shape: f32[16,32], index: 4, kind: output, shape index: {}]  }
   0x1 LB: > { %s151_s18 = sshll.u32 %s489_s1, 4  ;;  %s347_s19 = sadd.s32 4294967295, %s432_s15   ;;  %s432_s15 = sphi %s462_s15, %s15_s15   ;;  %s152_s18 = int_to_ptr.hbm [resolvable:$true] %s151_s18 }
   0x2   : > { %p349_p0 = scmp.ge.s32.totalorder %s432_s15, 1  ;;  %p140_p1 = scmp.lt.s32.totalorder %s432_s15, 3 }
   0x3   : > { %p378_p2 = scmp.eq.s32.totalorder %s347_s19, 0  ;;  %s434_s20 = smov [#allocation2]  }
   0x4   : > { %p141_p3 = pnand %p349_p0, %p140_p1  ;;  %s153_s21 = sshll.u32 %s434_s20, 4  ;;  %s154_s21 = int_to_ptr.vmem [resolvable:$true] %s153_s21 }
   0x5   : > { %s435_s22 = smov 64   ;;  %s436_s23 = smov 4  }
   0x6   : > { %p374_p4 = pneg %p141_p3  ;;  %186 = sbr.rel (%p141_p3) target bundleno = 154 (0x9a), region = 36 }
   0x8   : > { %p375_p5 = pnand %p378_p2, %p374_p4 }
   0xa   : > { %377 = dma.hbm_to_vmem [thread:$0]  (!%p375_p5), %s152_s18, 256, %s154_s21, [#allocation3], %s435_s22, %s435_s22, %s436_s23  }
   0xb   : > { %427 = dma.done.wait (%p378_p2), [#allocation3], 256  }
   0xc   : > { %429 = vsyncadd (%p378_p2), [#allocation3], 4294967040  ;;  %p215_p6 = scmp.lt.s32.totalorder %s347_s19, 1  ;;  %v369_v0 = vld [vmem:[#allocation2 + $0x8] sm:$0xff]  ;;  %v368_v1 = vld [vmem:[#allocation2] sm:$0xff]  ;;  %vm250_vm0 = vcmask 261120  }
   0xd   : > { %260 = vmatpush.bf16.msra.mxu0 %v369_v0  ;;  %v391_v4 = vld [vmem:[%s490_s2] ss:$0 sm:$0xff] }
   0xe   : > { %s494_s19 = smov (!%p215_p6, %s347_s19), 1 }
   0xf   : > { %s354_s24 = sshll.u32 %s494_s19, 3 }
  0x10   : > { %s218_s27 = scalar_lea.vmem %s488_s0, %s354_s24  ;;  %s222_s30 = scalar_lea.vmem %s491_s3, %s354_s24 }
  0x11   : > { %v228_v2 = vld [vmem:[%s218_s27] sm:$0xff]  ;;  %261 = vmatpush.bf16.msra.mxu0 %v368_v1  ;;  %s226_s9 = scalar_lea.vmem %s492_s4, %s354_s24 }
  0x12   : > { %v229_v3 = vpack.c.bf16 %v228_v2, %v228_v2  ;;  %v267_v6 = vld [vmem:[%s222_s30] sm:$0xff] }
  0x14   : > { %365 = vmatmul.msk.bf16.vlgmr.msra.gmra.mxu0 %vm250_vm0, %v229_v3 }
  0x91   : > { %v263_v5 = vpop.f32.mrf.mxu0 }
  0x92   : > { %v264_v7 = vadd.f32 %v391_v4, %v263_v5 }
  0x94   : > { %v268_v8 = vadd.f32 %v267_v6, %v264_v7 }
  0x96   : > { %269 = vst.msk [vmem:[%s226_s9] sm:$0xff] %vm250_vm0, %v268_v8 }
  0x99   : > { %v265_v9 = vpop.f32.mrf.mxu0 }
  0x9a PF: > { %s15_s15 = sadd.s32 1, %s432_s15  }
  0x9b   : > { %p12_p7 = scmp.ge.s32.totalorder %s15_s15, 4  }
  0x9d   :  { %14 = sbr.rel (!%p12_p7) target bundleno = 1 (0x1), region = 74 }
  0xa2   :  { %289 = vsyncpa [#allocation3], 1 }
  0xa3   :  { %291 = vsyncpa [#allocation3 + $0x1], 1 }

// kernel: decoder_layer.7
= control target key start
LH: loop header
LB: loop body
LE: loop exit
PB: predicated region body
PF: predicated region fallthrough
CT: control target
= control target key end

     0   :  { %s521_s18 = smov 0   ;;  %s523_s19 = smov 0   ;;  %s593_s0 = inlined_call_operand.vmem [shape: f32[16,32], index: 0, kind: input, shape index: {}]   ;;  %s594_s1 = inlined_call_operand.vmem [shape: f32[1,32], index: 1, kind: input, shape index: {}]   ;;  %s595_s2 = inlined_call_operand.vmem [shape: f32[1,32], index: 2, kind: input, shape index: {}]   ;;  %s596_s3 = inlined_call_operand.vmem [shape: bf16[32,96], index: 3, kind: input, shape index: {}]   ;;  %s597_s4 = inlined_call_operand.vmem [shape: f32[1,96], index: 4, kind: input, shape index: {}]   ;;  %s598_s5 = inlined_call_operand.vmem [shape: f32[3,16,32], index: 5, kind: output, shape index: {}]  }
   0x1   :  { %s525_s20 = smov 0  }
   0x2 LB: > { %s534_s21 = sadd.s32 4294967295, %s486_s20   ;;  %s536_s22 = sadd.s32 1, %s486_s20   ;;  %s486_s20 = sphi %s525_s20, %s602_s20   ;;  %s482_s19 = sphi %s523_s19, %s601_s19   ;;  %s478_s18 = sphi %s521_s18, %s600_s18  }
   0x3   : > { %s129_s23 = ssub.s32 %s486_s20, %s536_s22  ;;  %s132_s24 = sadd.s32 1, %s482_s19 }
   0x4   : > { %p130_p0 = scmp.eq.s32.totalorder %s129_s23, 0  ;;  %p142_p1 = scmp.ne.s32.totalorder %s482_s19, %s478_s18 }
   0x5   : > { %p143_p2 = scmp.eq.s32.totalorder %s534_s21, 1  ;;  %p411_p3 = scmp.ge.s32.totalorder %s486_s20, 1 }
   0x6   : > { %s544_s25 = scalar_select %p130_p0, %s482_s19, %s132_s24  }
   0x7   : > { %p546_p4 = por %p143_p2, %p142_p1  ;;  %p186_p5 = scmp.lt.s32.totalorder %s486_s20, 3 }
   0x9   : > { %p187_p6 = pnand %p411_p3, %p186_p5 }
   0xa   : > { %p212_p7 = scmp.lt.s32.totalorder (!%p187_p6), %s534_s21, 1  ;;  %s209_s15 = sand.u32 (!%p187_p6), 1, %s478_s18  }
   0xb   : > { %190 = sbr.rel (%p187_p6) target bundleno = 551 (0x227), region = 40  ;;  %s489_s23 = smov (!%p187_p6), 96  }
   0xc   : > { %s429_s16 = smul.u32 (!%p187_p6), 24, %s209_s15 }
   0xe   : > { %s211_s24 = scalar_lea.vmem (!%p187_p6), [#allocation2], %s429_s16 }
  0x10   : > { %s213_s27 = scalar_select %p212_p7, %s534_s21, 1  ;;  %vm218_vm0 = vcmask 261120   ;;  %v488_v2 = vmov 32.0   ;;  %v428_v14 = vld [vmem:[%s596_s3 + $0x8] sm:$0xff]  ;;  %v427_v15 = vld [vmem:[%s596_s3] sm:$0xff] }
  0x11   : > { %460 = vrcp.f32 %v488_v2  ;;  %288 = vmatpush.bf16.msra.mxu0 %v428_v14  ;;  %v457_v25 = vld [vmem:[%s594_s1] ss:$0 sm:$0xff]  ;;  %s424_s18 = sshll.u32 (%p546_p4), %s534_s21, 3 }
  0x12   : > { %s412_s28 = sshll.u32 %s213_s27, 3  ;;  %v458_v28 = vld [vmem:[%s595_s2] ss:$0 sm:$0xff]  ;;  %s490_s27 = smov 64  }
  0x13   : > { %s215_s6 = scalar_lea.vmem %s593_s0, %s412_s28  ;;  %v459_v32 = vld [vmem:[%s597_s4] ss:$0 sm:$0xff]  ;;  %s315_s30 = scalar_lea.vmem (%p546_p4), %s598_s5, %s424_s18 }
  0x14   : > { %v217_v0 = vld [vmem:[%s215_s6] sm:$0xff] }
  0x15   : > { %v219_v1 = vsel %vm218_vm0, %v217_v0, 0.0  ;;  %289 = vmatpush.bf16.msra.mxu0 %v427_v15 }
  0x16   : > { %220 = vadd.xlane.f32.xlu0 %v219_v1 }
  0x17   : > { %v461_v3 = vpop.eup %460 }
  0x18   : > { %v223_v4 = vmul.f32 32.0, %v461_v3  ;;  %vm227_vm1 = vweird.f32 %v461_v3 }
  0x1a   : > { %v224_v5 = vsub.f32 1.0, %v223_v4 }
  0x1c   : > { %v225_v6 = vmul.f32 %v461_v3, %v224_v5 }
  0x1e   : > { %v226_v7 = vadd.f32 %v461_v3, %v225_v6 }
  0x20   : > { %v228_v8 = vsel %vm227_vm1, %v461_v3, %v226_v7 }
  0x89   : > { %v221_v9 = vpop.xlane.xlu0 %220 }
  0x8a   : > { %v229_v10 = vmul.f32 %v228_v8, %v221_v9 }
  0x8c   : > { %v230_v11 = vsub.f32 %v217_v0, %v229_v10 }
  0x8e   : > { %v231_v12 = vmul.f32 %v230_v11, %v230_v11 }
  0x90   : > { %v232_v13 = vsel %vm218_vm0, %v231_v12, 0.0 }
  0x91   : > { %233 = vadd.xlane.f32.xlu0 %v232_v13 }
 0x104   : > { %v234_v16 = vpop.xlane.xlu0 %233 }
 0x105   : > { %v235_v17 = vmul.f32 %v234_v16, %v228_v8 }
 0x107   : > { %v236_v18 = vadd.f32 1e-05, %v235_v17 }
 0x109   : > { %462 = vrsqrt.f32 %v236_v18  ;;  %vm243_vm3 = vweird.f32 %v236_v18 }
 0x10f   : > { %v463_v19 = vpop.eup %462 }
 0x110   : > { %v238_v20 = vmul.f32 %v463_v19, %v236_v18  ;;  %vm244_vm2 = vweird.f32 %v463_v19 }
 0x111   : > { %vm245_vm4 = vmor %vm243_vm3, %vm244_vm2 }
 0x112   : > { %v239_v21 = vmul.f32 %v463_v19, %v238_v20 }
 0x114   : > { %v240_v22 = vmul.f32 0.5, %v239_v21 }
 0x116   : > { %v241_v23 = vsub.f32 1.5, %v240_v22 }
 0x118   : > { %v242_v24 = vmul.f32 %v463_v19, %v241_v23 }
 0x11a   : > { %v246_v26 = vsel %vm245_vm4, %v463_v19, %v242_v24 }
 0x11b   : > { %v247_v27 = vmul.f32 %v246_v26, %v230_v11 }
 0x11d   : > { %v252_v29 = vmul.f32 %v457_v25, %v247_v27 }
 0x11f   : > { %v257_v30 = vadd.f32 %v458_v28, %v252_v29 }
 0x121   : > { %v258_v31 = vpack.c.bf16 %v257_v30, %v257_v30 }
 0x123   : > { %421 = vmatmul.msk.bf16.vlgmr.msra.gmra.mxu0 %vm218_vm0, %v258_v31 }
 0x1a0   : > { %v291_v33 = vpop.f32.mrf.mxu0 }
 0x1a1   : > { %v292_v34 = vadd.f32 %v459_v32, %v291_v33 }
 0x1a3   : > { %297 = vrot.lane.b32.xlu1 %v292_v34, %s489_s23  ;;  %295 = vst.msk [vmem:[%s211_s24] sm:$0xff] %vm218_vm0, %v292_v34 }
 0x1a8   : > { %v293_v35 = vpop.f32.mrf.mxu0 }
 0x1aa   : > { %v348_v38 = vld [vmem:[%s211_s24] sm:$0xff] (%p546_p4) }
 0x1ab   : > { %302 = vrot.lane.b32.xlu1 %v292_v34, %s490_s27  ;;  %349 = vst [vmem:[%s315_s30] sm:$0xff] (%p546_p4), %v348_v38 }
 0x215   : > { %v298_v36 = vpop.permute.xlu1 %297 }
 0x216   : > { %422 = vst.msk [vmem:[%s211_s24 + $0x8] sm:$0xff] %vm218_vm0, %v298_v36 }
 0x21a   : > { %313 = sbr.rel (!%p546_p4) target bundleno = 551 (0x227), region = 44 }
 0x21d   : > { %v303_v37 = vpop.permute.xlu1 %302  ;;  %v350_v39 = vld [vmem:[%s211_s24 + $0x8] sm:$0xff] (%p546_p4) }
 0x21e   : > { %423 = vst.msk [vmem:[%s211_s24 + $0x10] sm:$0xff] %vm218_vm0, %v303_v37 }
 0x21f   : > { %351 = vst [vmem:[%s315_s30 + $0x10] sm:$0xff] %v350_v39 }
 0x225   : > { %v352_v40 = vld [vmem:[%s211_s24 + $0x10] sm:$0xff] }
 0x226   : > { %353 = vst [vmem:[%s315_s30 + $0x20] sm:$0xff] %v352_v40 }
 0x227 PF: > { %p12_p8 = scmp.ge.s32.totalorder %s536_s22, 4   ;;  %s600_s18 = smov %s482_s19 }
 0x228   : > { %s601_s19 = smov %s544_s25  ;;  %s602_s20 = smov %s536_s22 }
 0x229   :  { %14 = sbr.rel (!%p12_p8) target bundleno = 2 (0x2), region = 110 }

// kernel: decoder_layer.10
= control target key start
LH: loop header
LB: loop body
LE: loop exit
PB: predicated region body
PF: predicated region fallthrough
CT: control target
= control target key end

     0   :  { %10 = vsyncpa [#allocation3], 0  ;;  %s602_s18 = smov 0   ;;  %s604_s19 = smov 0   ;;  %s678_s0 = inlined_call_operand.vmem [shape: f32[16,32], index: 0, kind: input, shape index: {}]   ;;  %s679_s1 = inlined_call_operand.vmem [shape: f32[1,32], index: 1, kind: input, shape index: {}]   ;;  %s680_s2 = inlined_call_operand.vmem [shape: f32[1,32], index: 2, kind: input, shape index: {}]   ;;  %s681_s3 = inlined_call_operand.hbm [shape: bf16[32,96], index: 3, kind: input, shape index: {}]   ;;  %s682_s4 = inlined_call_operand.vmem [shape: f32[1,96], index: 4, kind: input, shape index: {}]   ;;  %s683_s5 = inlined_call_operand.vmem [shape: f32[3,16,32], index: 5, kind: output, shape index: {}]  }
   0x1   :  { %s606_s20 = smov 0  }
   0x2 LB: > { %s615_s21 = sadd.s32 4294967295, %s564_s20   ;;  %s617_s22 = sadd.s32 1, %s564_s20   ;;  %s564_s20 = sphi %s606_s20, %s687_s20   ;;  %s560_s19 = sphi %s604_s19, %s686_s19   ;;  %s556_s18 = sphi %s602_s18, %s685_s18  }
   0x3   : > { %s130_s23 = ssub.s32 %s564_s20, %s617_s22  ;;  %s133_s24 = sadd.s32 1, %s560_s19 }
   0x4   : > { %p131_p0 = scmp.eq.s32.totalorder %s130_s23, 0  ;;  %p143_p1 = scmp.ne.s32.totalorder %s560_s19, %s556_s18 }
   0x5   : > { %p144_p2 = scmp.eq.s32.totalorder %s615_s21, 1  ;;  %p438_p3 = scmp.ge.s32.totalorder %s564_s20, 1 }
   0x6   : > { %s625_s25 = scalar_select %p131_p0, %s560_s19, %s133_s24  }
   0x7   : > { %p627_p4 = por %p144_p2, %p143_p1  ;;  %p157_p5 = scmp.lt.s32.totalorder %s564_s20, 3 }
   0x8   : > { %p469_p6 = scmp.eq.s32.totalorder %s615_s21, 0  ;;  %s174_s29 = sshll.u32 %s681_s3, 4  ;;  %s175_s29 = int_to_ptr.hbm [resolvable:$true] %s174_s29 }
   0x9   : > { %p158_p7 = pnand %p438_p3, %p157_p5  ;;  %s566_s30 = smov [#allocation2]  }
   0xa   : > { %s176_s6 = sshll.u32 %s566_s30, 4  ;;  %s567_s7 = smov 64   ;;  %s177_s6 = int_to_ptr.vmem [resolvable:$true] %s176_s6 }
   0xb   : > { %p465_p8 = pneg %p158_p7  ;;  %s568_s8 = smov 4  }
   0xc   : > { %202 = sbr.rel (%p158_p7) target bundleno = 555 (0x22b), region = 40 }
   0xd   : > { %p466_p9 = pnand %p469_p6, %p465_p8 }
   0xf   : > { %468 = dma.hbm_to_vmem [thread:$0]  (!%p466_p9), %s175_s29, 256, %s177_s6, [#allocation3], %s567_s7, %s567_s7, %s568_s8  }
  0x11   : > { %551 = dma.done.wait (%p469_p6), [#allocation3], 256  }
  0x12   : > { %553 = vsyncadd (%p469_p6), [#allocation3], 4294967040  ;;  %p229_p10 = scmp.lt.s32.totalorder %s615_s21, 1  ;;  %vm235_vm0 = vcmask 261120   ;;  %v569_v2 = vmov 32.0   ;;  %v459_v14 = vld [vmem:[#allocation2 + $0x8] sm:$0xff] }
  0x13   : > { %504 = vrcp.f32 %v569_v2  ;;  %305 = vmatpush.bf16.msra.mxu0 %v459_v14  ;;  %v458_v15 = vld [vmem:[#allocation2] sm:$0xff]  ;;  %s226_s20 = sand.u32 1, %s556_s18   ;;  %s570_s28 = smov 96  }
  0x14   : > { %s230_s9 = scalar_select %p229_p10, %s615_s21, 1  ;;  %v501_v25 = vld [vmem:[%s679_s1] ss:$0 sm:$0xff] }
  0x15   : > { %v502_v28 = vld [vmem:[%s680_s2] ss:$0 sm:$0xff]  ;;  %s460_s23 = smul.u32 24, %s226_s20  ;;  %s571_s30 = smov 64  }
  0x16   : > { %s443_s10 = sshll.u32 %s230_s9, 3  ;;  %v503_v32 = vld [vmem:[%s682_s4] ss:$0 sm:$0xff]  ;;  %s455_s18 = sshll.u32 (%p627_p4), %s615_s21, 3 }
  0x17   : > { %s232_s13 = scalar_lea.vmem %s678_s0, %s443_s10  ;;  %306 = vmatpush.bf16.msra.mxu0 %v458_v15  ;;  %s228_s29 = scalar_lea.vmem [#allocation4], %s460_s23 }
  0x18   : > { %v234_v0 = vld [vmem:[%s232_s13] sm:$0xff]  ;;  %s332_s8 = scalar_lea.vmem (%p627_p4), %s683_s5, %s455_s18 }
  0x19   : > { %v236_v1 = vsel %vm235_vm0, %v234_v0, 0.0  ;;  %v505_v3 = vpop.eup %504 }
  0x1a   : > { %237 = vadd.xlane.f32.xlu0 %v236_v1  ;;  %v240_v4 = vmul.f32 32.0, %v505_v3  ;;  %vm244_vm1 = vweird.f32 %v505_v3 }
  0x1c   : > { %v241_v5 = vsub.f32 1.0, %v240_v4 }
  0x1e   : > { %v242_v6 = vmul.f32 %v505_v3, %v241_v5 }
  0x20   : > { %v243_v7 = vadd.f32 %v505_v3, %v242_v6 }
  0x22   : > { %v245_v8 = vsel %vm244_vm1, %v505_v3, %v243_v7 }
  0x8d   : > { %v238_v9 = vpop.xlane.xlu0 %237 }
  0x8e   : > { %v246_v10 = vmul.f32 %v245_v8, %v238_v9 }
  0x90   : > { %v247_v11 = vsub.f32 %v234_v0, %v246_v10 }
  0x92   : > { %v248_v12 = vmul.f32 %v247_v11, %v247_v11 }
  0x94   : > { %v249_v13 = vsel %vm235_vm0, %v248_v12, 0.0 }
  0x95   : > { %250 = vadd.xlane.f32.xlu0 %v249_v13 }
 0x108   : > { %v251_v16 = vpop.xlane.xlu0 %250 }
 0x109   : > { %v252_v17 = vmul.f32 %v251_v16, %v245_v8 }
 0x10b   : > { %v253_v18 = vadd.f32 1e-05, %v252_v17 }
 0x10d   : > { %506 = vrsqrt.f32 %v253_v18  ;;  %vm260_vm3 = vweird.f32 %v253_v18 }
 0x113   : > { %v507_v19 = vpop.eup %506 }
 0x114   : > { %v255_v20 = vmul.f32 %v507_v19, %v253_v18  ;;  %vm261_vm2 = vweird.f32 %v507_v19 }
 0x115   : > { %vm262_vm4 = vmor %vm260_vm3, %vm261_vm2 }
 0x116   : > { %v256_v21 = vmul.f32 %v507_v19, %v255_v20 }
 0x118   : > { %v257_v22 = vmul.f32 0.5, %v256_v21 }
 0x11a   : > { %v258_v23 = vsub.f32 1.5, %v257_v22 }
 0x11c   : > { %v259_v24 = vmul.f32 %v507_v19, %v258_v23 }
 0x11e   : > { %v263_v26 = vsel %vm262_vm4, %v507_v19, %v259_v24 }
 0x11f   : > { %v264_v27 = vmul.f32 %v263_v26, %v247_v11 }
 0x121   : > { %v269_v29 = vmul.f32 %v501_v25, %v264_v27 }
 0x123   : > { %v274_v30 = vadd.f32 %v502_v28, %v269_v29 }
 0x125   : > { %v275_v31 = vpack.c.bf16 %v274_v30, %v274_v30 }
 0x127   : > { %452 = vmatmul.msk.bf16.vlgmr.msra.gmra.mxu0 %vm235_vm0, %v275_v31 }
 0x1a4   : > { %v308_v33 = vpop.f32.mrf.mxu0 }
 0x1a5   : > { %v309_v34 = vadd.f32 %v503_v32, %v308_v33 }
 0x1a7   : > { %314 = vrot.lane.b32.xlu1 %v309_v34, %s570_s28  ;;  %312 = vst.msk [vmem:[%s228_s29] sm:$0xff] %vm235_vm0, %v309_v34 }
 0x1ac   : > { %v310_v35 = vpop.f32.mrf.mxu0 }
 0x1ae   : > { %v365_v38 = vld [vmem:[%s228_s29] sm:$0xff] (%p627_p4) }
 0x1af   : > { %319 = vrot.lane.b32.xlu1 %v309_v34, %s571_s30  ;;  %366 = vst [vmem:[%s332_s8] sm:$0xff] (%p627_p4), %v365_v38 }
 0x219   : > { %v315_v36 = vpop.permute.xlu1 %314 }
 0x21a   : > { %453 = vst.msk [vmem:[%s228_s29 + $0x8] sm:$0xff] %vm235_vm0, %v315_v36 }
 0x21e   : > { %330 = sbr.rel (!%p627_p4) target bundleno = 555 (0x22b), region = 48 }
 0x221   : > { %v320_v37 = vpop.permute.xlu1 %319  ;;  %v367_v39 = vld [vmem:[%s228_s29 + $0x8] sm:$0xff] (%p627_p4) }
 0x222   : > { %454 = vst.msk [vmem:[%s228_s29 + $0x10] sm:$0xff] %vm235_vm0, %v320_v37 }
 0x223   : > { %368 = vst [vmem:[%s332_s8 + $0x10] sm:$0xff] %v367_v39 }
 0x229   : > { %v369_v40 = vld [vmem:[%s228_s29 + $0x10] sm:$0xff] }
 0x22a   : > { %370 = vst [vmem:[%s332_s8 + $0x20] sm:$0xff] %v369_v40 }
 0x22b PF: > { %p13_p11 = scmp.ge.s32.totalorder %s617_s22, 4   ;;  %s685_s18 = smov %s560_s19 }
 0x22c   : > { %s686_s19 = smov %s625_s25  ;;  %s687_s20 = smov %s617_s22 }
 0x22d   :  { %15 = sbr.rel (!%p13_p11) target bundleno = 2 (0x2), region = 115 }
 0x232   :  { %386 = vsyncpa [#allocation3], 1 }
 0x233   :  { %388 = vsyncpa [#allocation3 + $0x1], 1 }

// kernel: decoder_layer.11
= control target key start
LH: loop header
LB: loop body
LE: loop exit
PB: predicated region body
PF: predicated region fallthrough
CT: control target
= control target key end

     0   :  { %9 = vsyncpa [#allocation3], 0  ;;  %s737_s15 = smov 0   ;;  %s806_s0 = inlined_call_operand.vmem [shape: f32[3,2,8,32], index: 0, kind: input, shape index: {}, may-alias: {0,1,2}]   ;;  %s807_s1 = inlined_call_operand.vmem [shape: f32[3,2,8,32], index: 1, kind: input, shape index: {}, may-alias: {0,1,2}]   ;;  %s808_s2 = inlined_call_operand.vmem [shape: f32[3,2,8,32], index: 2, kind: input, shape index: {}, may-alias: {0,1,2}]   ;;  %s809_s3 = inlined_call_operand.hbm [shape: f32[8,8], index: 3, kind: input, shape index: {}]   ;;  %s810_s4 = inlined_call_operand.vmem [shape: f32[2,8,32], index: 4, kind: output, shape index: {}]  }
   0x1 LB: > { %s599_s16 = sadd.s32 4294967295, %s703_s15   ;;  %p601_p0 = scmp.ge.s32.totalorder %s703_s15, 1  ;;  %s703_s15 = sphi %s737_s15, %s15_s15  }
   0x2   : > { %p145_p1 = scmp.lt.s32.totalorder %s703_s15, 3  ;;  %s157_s19 = sshll.u32 %s809_s3, 4  ;;  %s158_s19 = int_to_ptr.hbm [resolvable:$true] %s157_s19 }
   0x3   : > { %p630_p3 = scmp.eq.s32.totalorder %s599_s16, 0  ;;  %s705_s20 = smov [#allocation2]  }
   0x4   : > { %p146_p2 = pnand %p601_p0, %p145_p1  ;;  %s159_s21 = sshll.u32 %s705_s20, 4  ;;  %s160_s21 = int_to_ptr.vmem [resolvable:$true] %s159_s21 }
   0x6   : > { %p626_p4 = pneg %p146_p2  ;;  %195 = sbr.rel (%p146_p2) target bundleno = 832 (0x340), region = 36 }
   0x8   : > { %p627_p5 = pnand %p630_p3, %p626_p4 }
   0xa   : > { %629 = dma.hbm_to_vmem [thread:$0]  (!%p627_p5), %s158_s19, 128, %s160_s21, [#allocation3]  }
   0xb   : > { %698 = dma.done.wait (%p630_p3), [#allocation3], 128  }
   0xc   : > { %700 = vsyncadd (%p630_p3), [#allocation3], 4294967168  ;;  %p230_p6 = scmp.lt.s32.totalorder %s599_s16, 1  ;;  %vm256_vm0 = vcmask 64512   ;;  %s706_s29 = smov 120   ;;  %v255_v12 = vld [vmem:[#allocation2] sm:$0xff] }
   0xd   : > { %s707_s30 = smov 104   ;;  %s708_s5 = smov 112   ;;  %vm289_vm1 = vcmask 1043456   ;;  %vm498_vm2 = vcmask 130048   ;;  %vm500_vm3 = vcmask 195584   ;;  %vm502_vm4 = vcmask 261120  }
   0xe   : > { %s812_s16 = smov (!%p230_p6, %s599_s16), 1  ;;  %s709_s9 = smov 8  }
   0xf   : > { %s748_s22 = sshll.u32 %s812_s16, 3  ;;  %s710_s10 = smov 24  }
  0x10   : > { %s547_s25 = scalar_lea.vmem %s807_s1, %s748_s22  ;;  %s233_s28 = scalar_lea.vmem %s806_s0, %s748_s22 }
  0x11   : > { %v610_v0 = vld [vmem:[%s547_s25 + $0x10] sm:$0xff]  ;;  %v249_v1 = vld [vmem:[%s233_s28] sm:$0xff]  ;;  %s550_s8 = scalar_lea.vmem %s808_s2, %s748_s22  ;;  %s711_s11 = smov 16  }
  0x12   : > { %v252_v2 = vpack.c.bf16 %v610_v0, %v610_v0  ;;  %v250_v3 = vpack.c.bf16 %v249_v1, %v249_v1  ;;  %v611_v19 = vld [vmem:[%s550_s8 + $0x20] sm:$0xff]  ;;  %s247_s14 = scalar_lea.vmem %s810_s4, %s748_s22 }
  0x13   : > { %v254_v20 = vpack.c.bf16 %v611_v19, %v611_v19 }
  0x14   : > { %v261_v4 = vsel %vm256_vm0, %v252_v2, 0  ;;  %v314_v5 = vunpack.c.l.b16 %v252_v2  ;;  %v309_v6 = vunpack.c.l.b16 %v250_v3 }
  0x15   : > { %270 = vmatpush.bf16.xpose.msra.mxu0 %v261_v4  ;;  %v291_v21 = vsel %vm289_vm1, %v254_v20, 0  ;;  %v348_v23 = vunpack.c.l.b16 %v254_v20 }
  0x16   : > { %v310_v7 = vpack.c.b16 %v309_v6, %v309_v6  ;;  %v315_v8 = vpack.c.b16 %v314_v5, %v314_v5  ;;  %300 = vmatpush.bf16.msra.mxu1 %v291_v21 }
  0x17   : > { %v349_v24 = vpack.c.b16 %v348_v23, %v348_v23 }
  0x18   : > { %311 = vrot.lane.b32.xlu1 %v310_v7, %s706_s29  ;;  %431 = vrot.lane.b32.xlu2 %v315_v8, %s707_s30 }
  0x1c   : > { %612 = vmatmul.msk.bf16.vlgmr.msra.gmra.mxu0 %vm256_vm0, %v250_v3 }
  0x20   : > { %375 = vrot.lane.b32.xlu1 %v315_v8, %s708_s5  ;;  %373 = vrot.lane.b32.xlu2 %v310_v7, %s708_s5 }
  0x28   : > { %429 = vrot.lane.b32.xlu1 %v310_v7, %s707_s30 }
  0x30   : > { %350 = vrot.lane.b32.xlu1 %v349_v24, %s706_s29 }
  0x72   : > { %v432_v10 = vpop.permute.xlu2 %431 }
  0x73   : > { %v437_v11 = vsel %vm256_vm0, %v432_v10, 0 }
  0x74   : > { %446 = vmatpush.bf16.xpose.msrb.mxu0 %v437_v11 }
  0x7a   : > { %v374_v34 = vpop.permute.xlu2 %373 }
  0x8a   : > { %v312_v9 = vpop.permute.xlu1 %311 }
  0x92   : > { %v376_v14 = vpop.permute.xlu1 %375 }
  0x93   : > { %v381_v22 = vsel %vm256_vm0, %v376_v14, 0 }
  0x94   : > { %390 = vmatpush.bf16.xpose.msrb.mxu1 %v381_v22 }
  0x99   : > { %v272_v13 = vpop.f32.mrf.mxu0 }
  0x9a   : > { %v273_v15 = vadd.f32 %v272_v13, %v255_v12  ;;  %v430_v18 = vpop.permute.xlu1 %429 }
  0x9b   : > { %618 = vmatmul.msk.bf16.vlgmr.msrb.gmra.mxu0 %vm256_vm0, %v430_v18 }
  0x9c   : > { %v276_v16 = vsel %vm256_vm0, %v273_v15, -inf }
  0x9d   : > { %277 = vmax.xlane.f32.xlu0 %v276_v16 }
  0xa1   : > { %v274_v17 = vpop.f32.mrf.mxu0 }
  0xa2   : > { %v351_v48 = vpop.permute.xlu1 %350 }
  0xa3   : > { %v356_v49 = vsel %vm289_vm1, %v351_v48, 0 }
  0xa4   : > { %365 = vmatpush.bf16.msra.mxu3 %v356_v49 }
  0xb1   : > { %316 = vrot.lane.b32.xlu0 %v315_v8, %s706_s29 }
 0x110   : > { %v278_v25 = vpop.xlane.xlu0 %277 }
 0x111   : > { %v279_v26 = vsub.f32 %v273_v15, %v278_v25 }
 0x113   : > { %v280_v27 = vmul.f32 1.442695, %v279_v26 }
 0x115   : > { %647 = vpow2.f32 %v280_v27 }
 0x118   : > { %v448_v30 = vpop.f32.mrf.mxu0 }
 0x119   : > { %v449_v35 = vadd.f32 %v448_v30, %v255_v12 }
 0x11b   : > { %v648_v28 = vpop.eup %647  ;;  %v452_v36 = vsel %vm256_vm0, %v449_v35, -inf }
 0x11c   : > { %v285_v29 = vpack.c.bf16 %v648_v28, %v648_v28  ;;  %453 = vmax.xlane.f32.xlu1 %v452_v36  ;;  %v282_v47 = vsel %vm256_vm0, %v648_v28, 0.0 }
 0x11e   : > { %613 = vmatmul.msk.bf16.vlgmr.msra.gmra.mxu1 %vm256_vm0, %v285_v29 }
 0x120   : > { %v450_v33 = vpop.f32.mrf.mxu0 }
 0x123   : > { %v317_v31 = vpop.permute.xlu0 %316 }
 0x124   : > { %v322_v32 = vsel %vm256_vm0, %v317_v31, 0 }
 0x125   : > { %331 = vmatpush.bf16.xpose.msra.mxu2 %v322_v32 }
 0x12c   : > { %614 = vmatmul.msk.bf16.vlgmr.msra.gmra.mxu2 %vm256_vm0, %v312_v9 }
 0x12e   : > { %616 = vmatmul.msk.bf16.vlgmr.msrb.gmra.mxu1 %vm256_vm0, %v374_v34 }
 0x18f   : > { %v454_v52 = vpop.xlane.xlu1 %453 }
 0x190   : > { %v455_v55 = vsub.f32 %v449_v35, %v454_v52 }
 0x192   : > { %v456_v58 = vmul.f32 1.442695, %v455_v55 }
 0x19b   : > { %v781_v37 = vpop.f32.mrf.mxu1 }
 0x1a3   : > { %v304_v38 = vpop.f32.mrf.mxu1 }
 0x1ab   : > { %v392_v39 = vpop.f32.mrf.mxu1 }
 0x1ac   : > { %v393_v40 = vadd.f32 %v392_v39, %v255_v12 }
 0x1ae   : > { %v396_v41 = vsel %vm256_vm0, %v393_v40, -inf }
 0x1af   : > { %397 = vmax.xlane.f32.xlu0 %v396_v41  ;;  %v333_v42 = vpop.f32.mrf.mxu2 }
 0x1b0   : > { %v334_v43 = vadd.f32 %v333_v42, %v255_v12 }
 0x1b2   : > { %v337_v44 = vsel %vm256_vm0, %v334_v43, -inf }
 0x1b3   : > { %338 = vmax.xlane.f32.xlu2 %v337_v44  ;;  %v394_v45 = vpop.f32.mrf.mxu1 }
 0x1b7   : > { %v335_v46 = vpop.f32.mrf.mxu2 }
 0x1c3   : > { %462 = vrot.lane.b32.xlu0 %v349_v24, %s707_s30 }
 0x1cb   : > { %406 = vrot.lane.b32.xlu2 %v349_v24, %s708_s5 }
 0x1ed   : > { %283 = vadd.xlane.f32.xlu0 %v282_v47 }
 0x222   : > { %v398_v50 = vpop.xlane.xlu0 %397 }
 0x223   : > { %v399_v51 = vsub.f32 %v393_v40, %v398_v50 }
 0x225   : > { %v400_v53 = vmul.f32 1.442695, %v399_v51 }
 0x226   : > { %v339_v54 = vpop.xlane.xlu2 %338 }
 0x227   : > { %649 = vpow2.f32 %v400_v53  ;;  %v340_v56 = vsub.f32 %v334_v43, %v339_v54 }
 0x229   : > { %v341_v57 = vmul.f32 1.442695, %v340_v56 }
 0x22b   : > { %651 = vpow2.f32 %v341_v57 }
 0x22c   : > { %653 = vpow2.f32 %v456_v58 }
 0x22d   : > { %v650_v59 = vpop.eup %649 }
 0x22e   : > { %v402_v60 = vsel %vm256_vm0, %v650_v59, 0.0  ;;  %v407_v61 = vpop.permute.xlu2 %406  ;;  %v405_v7 = vpack.c.bf16 %v650_v59, %v650_v59 }
 0x22f   : > { %403 = vadd.xlane.f32.xlu2 %v402_v60  ;;  %v412_v62 = vsel %vm289_vm1, %v407_v61, 0 }
 0x230   : > { %421 = vmatpush.bf16.msrb.mxu3 %v412_v62 }
 0x231   : > { %v652_v63 = vpop.eup %651 }
 0x232   : > { %v343_v0 = vsel %vm256_vm0, %v652_v63, 0.0  ;;  %v346_v1 = vpack.c.bf16 %v652_v63, %v652_v63  ;;  %v654_v2 = vpop.eup %653 }
 0x233   : > { %344 = vadd.xlane.f32.xlu1 %v343_v0  ;;  %v461_v5 = vpack.c.bf16 %v654_v2, %v654_v2  ;;  %v458_v6 = vsel %vm256_vm0, %v654_v2, 0.0 }
 0x234   : > { %615 = vmatmul.msk.bf16.vlgmr.msra.gmra.mxu3 %vm256_vm0, %v346_v1 }
 0x235   : > { %v463_v3 = vpop.permute.xlu0 %462 }
 0x236   : > { %v468_v4 = vsel %vm289_vm1, %v463_v3, 0 }
 0x237   : > { %477 = vmatpush.bf16.msrb.mxu2 %v468_v4 }
 0x23a   : > { %619 = vmatmul.msk.bf16.vlgmr.msrb.gmra.mxu2 %vm256_vm0, %v461_v5 }
 0x23b   : > { %459 = vadd.xlane.f32.xlu1 %v458_v6 }
 0x244   : > { %617 = vmatmul.msk.bf16.vlgmr.msrb.gmra.mxu3 %vm256_vm0, %v405_v7 }
 0x260   : > { %v284_v23 = vpop.xlane.xlu0 %283 }
 0x2a2   : > { %v404_v15 = vpop.xlane.xlu2 %403 }
 0x2a6   : > { %v345_v8 = vpop.xlane.xlu1 %344 }
 0x2a7   : > { %655 = vrcp.f32 %v345_v8 }
 0x2ad   : > { %v656_v10 = vpop.eup %655 }
 0x2ae   : > { %v460_v9 = vpop.xlane.xlu1 %459 }
 0x2af   : > { %657 = vrcp.f32 %v460_v9 }
 0x2b0   : > { %659 = vrcp.f32 %v404_v15 }
 0x2b1   : > { %661 = vrcp.f32 %v284_v23 }
 0x2b5   : > { %v658_v13 = vpop.eup %657 }
 0x2b6   : > { %v660_v19 = vpop.eup %659 }
 0x2b7   : > { %v367_v11 = vpop.f32.mrf.mxu3  ;;  %v662_v25 = vpop.eup %661 }
 0x2b8   : > { %v372_v12 = vmul.f32 %v656_v10, %v367_v11  ;;  %v307_v26 = vmul.f32 %v662_v25, %v781_v37 }
 0x2ba   : > { %486 = vrot.lane.b32.xlu1 %v372_v12, %s709_s9 }
 0x2bd   : > { %v479_v14 = vpop.f32.mrf.mxu2 }
 0x2be   : > { %v484_v16 = vmul.f32 %v658_v13, %v479_v14 }
 0x2bf   : > { %v369_v17 = vpop.f32.mrf.mxu3 }
 0x2c0   : > { %494 = vrot.lane.b32.xlu2 %v484_v16, %s710_s10 }
 0x2c5   : > { %v481_v18 = vpop.f32.mrf.mxu2 }
 0x2c7   : > { %v423_v20 = vpop.f32.mrf.mxu3 }
 0x2c8   : > { %v428_v21 = vmul.f32 %v660_v19, %v423_v20 }
 0x2ca   : > { %490 = vrot.lane.b32.xlu1 %v428_v21, %s711_s11 }
 0x2cf   : > { %v425_v22 = vpop.f32.mrf.mxu3 }
 0x31a   : > { %v495_v29 = vpop.permute.xlu2 %494 }
 0x32c   : > { %v487_v24 = vpop.permute.xlu1 %486 }
 0x32d   : > { %v497_v27 = vsel %vm256_vm0, %v307_v26, %v487_v24 }
 0x33c   : > { %v491_v28 = vpop.permute.xlu1 %490 }
 0x33d   : > { %v499_v30 = vsel %vm498_vm2, %v497_v27, %v491_v28 }
 0x33e   : > { %v501_v31 = vsel %vm500_vm3, %v499_v30, %v495_v29 }
 0x33f   : > { %503 = vst.msk [vmem:[%s247_s14] sm:$0xff] %vm502_vm4, %v501_v31 }
 0x340 PF: > { %s15_s15 = sadd.s32 1, %s703_s15  }
 0x341   : > { %p12_p7 = scmp.ge.s32.totalorder %s15_s15, 4  }
 0x343   :  { %14 = sbr.rel (!%p12_p7) target bundleno = 1 (0x1), region = 77 }
 0x348   :  { %523 = vsyncpa [#allocation3], 1 }
 0x349   :  { %525 = vsyncpa [#allocation3 + $0x1], 1 }

// kernel: decoder_layer.13
= control target key start
LH: loop header
LB: loop body
LE: loop exit
PB: predicated region body
PF: predicated region fallthrough
CT: control target
= control target key end

     0   :  { %s570_s24 = smov 0   ;;  %s633_s0 = inlined_call_operand.vmem [shape: f32[16,32], index: 0, kind: input, shape index: {}]   ;;  %s634_s1 = inlined_call_operand.vmem [shape: f32[1,32], index: 1, kind: input, shape index: {}]   ;;  %s635_s2 = inlined_call_operand.vmem [shape: f32[1,32], index: 2, kind: input, shape index: {}]   ;;  %s636_s3 = inlined_call_operand.vmem [shape: bf16[32,64], index: 3, kind: input, shape index: {}]   ;;  %s637_s4 = inlined_call_operand.vmem [shape: f32[1,64], index: 4, kind: input, shape index: {}]   ;;  %s638_s5 = inlined_call_operand.vmem [shape: bf16[64,32], index: 5, kind: input, shape index: {}]   ;;  %s639_s6 = inlined_call_operand.vmem [shape: f32[1,32], index: 6, kind: input, shape index: {}]   ;;  %s640_s7 = inlined_call_operand.vmem [shape: f32[16,32], index: 7, kind: output, shape index: {}]  }
   0x1 LB: > { %s463_s25 = sadd.s32 4294967295, %s527_s24   ;;  %p467_p0 = scmp.ge.s32.totalorder %s527_s24, 1  ;;  %s527_s24 = sphi %s570_s24, %s17_s24  }
   0x2   : > { %p236_p1 = scmp.lt.s32.totalorder %s527_s24, 3 }
   0x4   : > { %p237_p2 = pnand %p467_p0, %p236_p1 }
   0x5   : > { %p266_p3 = scmp.lt.s32.totalorder (!%p237_p2), %s463_s25, 1 }
   0x6   : > { %240 = sbr.rel (%p237_p2) target bundleno = 551 (0x227), region = 48 }
   0xb   : > { %s642_s25 = smov (!%p266_p3, %s463_s25), 1  ;;  %vm276_vm0 = vcmask 261120   ;;  %v529_v2 = vmov 32.0   ;;  %v499_v14 = vld [vmem:[%s636_s3 + $0x8] sm:$0xff]  ;;  %v498_v15 = vld [vmem:[%s636_s3] sm:$0xff]  ;;  %v503_v16 = vld [vmem:[%s638_s5 + $0x18] sm:$0xff] }
   0xc   : > { %s468_s26 = sshll.u32 %s642_s25, 3  ;;  %517 = vrcp.f32 %v529_v2  ;;  %346 = vmatpush.bf16.msra.mxu0 %v499_v14  ;;  %399 = vmatpush.bf16.msra.mxu1 %v503_v16  ;;  %v502_v19 = vld [vmem:[%s638_s5 + $0x10] sm:$0xff]  ;;  %v513_v27 = vld [vmem:[%s634_s1] ss:$0 sm:$0xff]  ;;  %v501_v34 = vld [vmem:[%s638_s5 + $0x8] sm:$0xff]  ;;  %vm391_vm5 = vcmask 523264  }
   0xd   : > { %s269_s29 = scalar_lea.vmem %s633_s0, %s468_s26  ;;  %v514_v30 = vld [vmem:[%s635_s2] ss:$0 sm:$0xff]  ;;  %s273_s9 = scalar_lea.vmem %s640_s7, %s468_s26 }
   0xe   : > { %v586_v0 = vld [vmem:[%s269_s29] sm:$0xff] }
   0xf   : > { %v277_v1 = vsel %vm276_vm0, %v586_v0, 0.0  ;;  %v500_v35 = vld [vmem:[%s638_s5] sm:$0xff] }
  0x10   : > { %278 = vadd.xlane.f32.xlu0 %v277_v1  ;;  %347 = vmatpush.bf16.msra.mxu0 %v498_v15  ;;  %v515_v36 = vld [vmem:[%s637_s4] ss:$0 sm:$0xff] }
  0x11   : > { %400 = vmatpush.bf16.msra.mxu1 %v502_v19  ;;  %v516_v42 = vld [vmem:[%s639_s6] ss:$0 sm:$0xff] }
  0x12   : > { %v518_v3 = vpop.eup %517 }
  0x13   : > { %v281_v4 = vmul.f32 32.0, %v518_v3  ;;  %vm285_vm1 = vweird.f32 %v518_v3 }
  0x15   : > { %v282_v5 = vsub.f32 1.0, %v281_v4  ;;  %401 = vmatpush.bf16.msra.mxu1 %v501_v34 }
  0x17   : > { %v283_v6 = vmul.f32 %v518_v3, %v282_v5 }
  0x19   : > { %v284_v7 = vadd.f32 %v518_v3, %v283_v6  ;;  %402 = vmatpush.bf16.msra.mxu1 %v500_v35 }
  0x1b   : > { %v286_v8 = vsel %vm285_vm1, %v518_v3, %v284_v7 }
  0x83   : > { %v279_v9 = vpop.xlane.xlu0 %278 }
  0x84   : > { %v287_v10 = vmul.f32 %v286_v8, %v279_v9 }
  0x86   : > { %v288_v11 = vsub.f32 %v586_v0, %v287_v10 }
  0x88   : > { %v289_v12 = vmul.f32 %v288_v11, %v288_v11 }
  0x8a   : > { %v290_v13 = vsel %vm276_vm0, %v289_v12, 0.0 }
  0x8b   : > { %291 = vadd.xlane.f32.xlu0 %v290_v13 }
  0xfe   : > { %v292_v17 = vpop.xlane.xlu0 %291 }
  0xff   : > { %v293_v18 = vmul.f32 %v292_v17, %v286_v8 }
 0x101   : > { %v294_v20 = vadd.f32 1e-05, %v293_v18 }
 0x103   : > { %519 = vrsqrt.f32 %v294_v20  ;;  %vm301_vm3 = vweird.f32 %v294_v20 }
 0x109   : > { %v520_v21 = vpop.eup %519 }
 0x10a   : > { %v296_v22 = vmul.f32 %v520_v21, %v294_v20  ;;  %vm302_vm2 = vweird.f32 %v520_v21 }
 0x10b   : > { %vm303_vm4 = vmor %vm301_vm3, %vm302_vm2 }
 0x10c   : > { %v297_v23 = vmul.f32 %v520_v21, %v296_v22 }
 0x10e   : > { %v298_v24 = vmul.f32 0.5, %v297_v23 }
 0x110   : > { %v299_v25 = vsub.f32 1.5, %v298_v24 }
 0x112   : > { %v300_v26 = vmul.f32 %v520_v21, %v299_v25 }
 0x114   : > { %v304_v28 = vsel %vm303_vm4, %v520_v21, %v300_v26 }
 0x115   : > { %v305_v29 = vmul.f32 %v304_v28, %v288_v11 }
 0x117   : > { %v310_v31 = vmul.f32 %v513_v27, %v305_v29 }
 0x119   : > { %v315_v32 = vadd.f32 %v514_v30, %v310_v31 }
 0x11b   : > { %v316_v33 = vpack.c.bf16 %v315_v32, %v315_v32 }
 0x11d   : > { %478 = vmatmul.msk.bf16.vlgmr.msra.gmra.mxu0 %vm276_vm0, %v316_v33 }
 0x19a   : > { %v349_v37 = vpop.f32.mrf.mxu0 }
 0x19b   : > { %v350_v38 = vadd.f32 %v515_v36, %v349_v37 }
 0x19d   : > { %v353_v39 = vmax.f32 %v350_v38, 0.0 }
 0x19f   : > { %v354_v40 = vpack.c.bf16 %v353_v39, %v353_v39 }
 0x1a1   : > { %495 = vmatmul.msk.bf16.vlgmr.msra.gmra.mxu1 %vm391_vm5, %v354_v40 }
 0x1a2   : > { %v351_v41 = vpop.f32.mrf.mxu0 }
 0x21e   : > { %v404_v43 = vpop.f32.mrf.mxu1 }
 0x21f   : > { %v405_v44 = vadd.f32 %v516_v42, %v404_v43 }
 0x221   : > { %v408_v45 = vadd.f32 %v405_v44, %v586_v0 }
 0x223   : > { %409 = vst.msk [vmem:[%s273_s9] sm:$0xff] %vm276_vm0, %v408_v45 }
 0x226   : > { %v406_v46 = vpop.f32.mrf.mxu1 }
 0x227 PF: > { %s17_s24 = sadd.s32 1, %s527_s24  }
 0x228   : > { %p14_p4 = scmp.ge.s32.totalorder %s17_s24, 4  }
 0x22a   :  { %16 = sbr.rel (!%p14_p4) target bundleno = 1 (0x1), region = 78 }

</bundles_post_ra>
